<compile_context>
chip_gen: v7x
topology: tpu7x:2x2x1
jax: 0.10.0
libtpu: 0.0.40
codegen_flags: <defaults>
</compile_context>

<pallas_src>
import functools
import math

import jax
import jax.numpy as jnp
from jax.experimental import pallas as pl
from jax.experimental.pallas import tpu as pltpu

LN_EPS = 1e-5


def _layernorm(x, gamma, beta):
    # fp32 layernorm (matches the fp16-safe LayerNorm subclass).
    mu = jnp.mean(x, axis=-1, keepdims=True)
    var = jnp.mean((x - mu) ** 2, axis=-1, keepdims=True)
    return (x - mu) * jax.lax.rsqrt(var + LN_EPS) * gamma + beta


def _transformer_kernel(d_model, n_head, L, Lp, B, has_user_mask, *refs):
    """Fused Transformer. grid = (batch_blocks, layers); B sequences / step."""
    if has_user_mask:
        mask_ref, refs = refs[0], refs[1:]
    else:
        mask_ref = None
    (x_ref, ln1_g_ref, ln1_b_ref, w_in_ref, b_in_ref, w_out_ref, b_out_ref,
     ln2_g_ref, ln2_b_ref, w_fc_ref, b_fc_ref, w_pr_ref, b_pr_ref,
     o_ref, act_ref, ctx_ref) = refs

    layer = pl.program_id(1)
    hd = d_model // n_head
    bf16, f32 = jnp.bfloat16, jnp.float32

    # Load the B-sequence activation slab into the persistent VMEM scratch.
    @pl.when(layer == 0)
    def _():
        act_ref[...] = x_ref[...]

    x = act_ref[...]                                           # (B*Lp, D) f32

    # ---------------- attention branch ----------------
    h = _layernorm(x, ln1_g_ref[0], ln1_b_ref[0])              # ln_1 (f32)

    # Fused qkv projection over all B*Lp rows at once (big-M MXU matmul).
    # 1/sqrt(hd) is already folded into the Q third of w_in / b_in.
    qkv = jnp.dot(h.astype(bf16), w_in_ref[0],
                  preferred_element_type=f32) + b_in_ref[0]    # (B*Lp, 3D) f32
    q = qkv[:, 0 * d_model:1 * d_model]
    k = qkv[:, 1 * d_model:2 * d_model]
    v = qkv[:, 2 * d_model:3 * d_model]

    # Additive attention bias: user mask, else in-kernel padded-key masking.
    if has_user_mask:
        bias = mask_ref[...]                                   # (Lp, Lp) f32
    elif Lp != L:
        col = jax.lax.broadcasted_iota(jnp.int32, (Lp, Lp), 1)
        bias = jnp.where(col >= L, -1e9, 0.0).astype(f32)
    else:
        bias = None

    # Per-sequence, per-head attention.  Context goes straight into ctx_ref at
    # static slices — no concatenate, no reshape/transpose VMEM copies.
    for b in range(B):
        r0 = b * Lp
        for hh in range(n_head):
            c0 = hh * hd
            qh = q[r0:r0 + Lp, c0:c0 + hd].astype(bf16)        # (Lp, hd)
            kh = k[r0:r0 + Lp, c0:c0 + hd].astype(bf16)
            vh = v[r0:r0 + Lp, c0:c0 + hd].astype(bf16)
            s = jax.lax.dot_general(qh, kh, (((1,), (1,)), ((), ())),
                                    preferred_element_type=f32)  # (Lp, Lp)
            if bias is not None:
                s = s + bias
            m = jnp.max(s, axis=-1, keepdims=True)
            e = jnp.exp(s - m)
            p = e * pl.reciprocal(jnp.sum(e, axis=-1, keepdims=True),
                                  approx=True)
            ctx_ref[r0:r0 + Lp, c0:c0 + hd] = jnp.dot(
                p.astype(bf16), vh, preferred_element_type=f32)

    attn_out = jnp.dot(ctx_ref[...].astype(bf16), w_out_ref[0],
                       preferred_element_type=f32) + b_out_ref[0]
    x = x + attn_out                                           # residual 1

    # ---------------- MLP branch ----------------
    h2 = _layernorm(x, ln2_g_ref[0], ln2_b_ref[0])             # ln_2 (f32)
    fc = jnp.dot(h2.astype(bf16), w_fc_ref[0],
                 preferred_element_type=f32) + b_fc_ref[0]     # (B*Lp, 4D)
    fc = fc * jax.nn.sigmoid(1.702 * fc)                       # QuickGELU (f32)
    # TODO(synk): for very large widths on v7x (64 MiB VMEM, D >~ 1100), K/N-tile
    # w_fc / w_pr over the 4D hidden dim (pltpu.emit_pipeline or an extra grid
    # axis) with an f32 accumulator instead of holding whole layer weights.
    mlp_out = jnp.dot(fc.astype(bf16), w_pr_ref[0],
                      preferred_element_type=f32) + b_pr_ref[0]
    x = x + mlp_out                                            # residual 2

    act_ref[...] = x

    @pl.when(layer == pl.num_programs(1) - 1)
    def _():
        o_ref[...] = act_ref[...]


def _pick_batch_block(N, Lp, D):
    """Choose B sequences per grid step: drive matmul M = B*Lp toward >=256
    (fills the 256x256 MXU on v6e/v7x; multiples of 128 cover v5e), divide the
    HBM weight restream by B, stay within a modest VMEM activation budget, and
    keep >=2 batch-axis grid steps for v7x megacore when that does not starve
    the MXU."""
    B = max(1, min(N, -(-256 // Lp)))
    # ~13 * M * D f32 bytes of live activations (qkv, fc, act, ctx, i/o blocks)
    while B > 1 and 13 * B * Lp * D * 4 > (12 << 20):
        B -= 1
    while B > 1 and -(-N // B) < 2 and (B - 1) * Lp >= 256:
        B -= 1
    return B


def _vmem_limit_bytes(B, Lp, D):
    M = B * Lp
    wbytes = 2 * 12 * D * D + 4 * 14 * D        # bf16 matrices + f32 vectors / layer
    iobytes = 4 * M * D                         # one f32 x/out block
    actbytes = 4 * M * (2 * D + 3 * D + 4 * D) + 3 * 4 * Lp * Lp
    need = 2 * wbytes + 2 * 2 * iobytes + actbytes + (4 << 20)
    try:                                        # generation-aware cap w/ headroom
        cap = pltpu.get_tpu_info().vmem_capacity_bytes - (8 << 20)
    except Exception:
        cap = 48 << 20                          # safe fallback on v5e/v6e/v7x
    return int(max(16 << 20, min(cap, need)))


def init_transformer_params(key, width, layers, heads):
    """Deterministic synthetic parameters.

    Weight matrices are stored PRE-TRANSPOSED (K-major = torch weight.T) in
    bfloat16; biases / LayerNorm params stay fp32.  The 1/sqrt(head_dim)
    attention scale is folded into the Q third of the in-projection.  To load
    real PyTorch weights: w_in = in_proj_weight.T (scale Q columns), w_out =
    out_proj.weight.T, w_fc = c_fc.weight.T, w_pr = c_proj.weight.T.
    """
    d = width
    hd = d // heads
    q_scale = 1.0 / math.sqrt(hd)
    s = 0.02
    ks = jax.random.split(key, 6)
    f32, bf16 = jnp.float32, jnp.bfloat16
    w_in = s * jax.random.normal(ks[0], (layers, d, 3 * d), f32)
    b_in = s * jax.random.normal(ks[1], (layers, 1, 3 * d), f32)
    w_in = w_in.at[:, :, :d].multiply(q_scale)       # fold attention scale
    b_in = b_in.at[:, :, :d].multiply(q_scale)
    return {
        'ln1_g': jnp.ones((layers, 1, d), f32),
        'ln1_b': jnp.zeros((layers, 1, d), f32),
        'w_in':  w_in.astype(bf16),
        'b_in':  b_in,
        'w_out': (s * jax.random.normal(ks[2], (layers, d, d), f32)).astype(bf16),
        'b_out': jnp.zeros((layers, 1, d), f32),
        'ln2_g': jnp.ones((layers, 1, d), f32),
        'ln2_b': jnp.zeros((layers, 1, d), f32),
        'w_fc':  (s * jax.random.normal(ks[3], (layers, d, 4 * d), f32)).astype(bf16),
        'b_fc':  s * jax.random.normal(ks[4], (layers, 1, 4 * d), f32),
        'w_pr':  (s * jax.random.normal(ks[5], (layers, 4 * d, d), f32)).astype(bf16),
        'b_pr':  jnp.zeros((layers, 1, d), f32),
    }


def _prep_mask(attn_mask, L, Lp):
    am = jnp.asarray(attn_mask)
    if am.dtype == jnp.bool_:                   # PyTorch bool mask: True = disallow
        am = jnp.where(am, -1e9, 0.0)
    am = am.astype(jnp.float32)
    mask = jnp.zeros((Lp, Lp), jnp.float32).at[:L, :L].set(am)
    if Lp != L:
        mask = mask.at[:, L:].set(-1e9)         # mask padded key columns
    return mask


def transformer_forward(x_lnd, params, width, heads, attn_mask=None):
    """x_lnd: (seq, batch, width) like the PyTorch module. Returns same shape."""
    L, N, D = x_lnd.shape
    assert D == width and width % heads == 0
    layers = params['w_in'].shape[0]

    Lp = ((L + 15) // 16) * 16                  # bf16 sublane pack: multiple of 16
    has_user_mask = attn_mask is not None

    B = _pick_batch_block(N, Lp, D)
    NB = -(-N // B)
    Np = NB * B

    x = jnp.transpose(x_lnd, (1, 0, 2)).astype(jnp.float32)        # (N, L, D)
    x = jnp.pad(x, ((0, Np - N), (0, Lp - L), (0, 0)))
    x = x.reshape(Np * Lp, D)                                       # lane-dense slab

    inputs, in_specs = [], []
    if has_user_mask:
        inputs.append(_prep_mask(attn_mask, L, Lp))
        in_specs.append(pl.BlockSpec((Lp, Lp), lambda b, l: (0, 0)))

    inputs.append(x)
    in_specs.append(pl.BlockSpec((B * Lp, D), lambda b, l: (b, 0)))

    def layer_spec(arr):
        shape = (1,) + arr.shape[1:]
        return pl.BlockSpec(shape, lambda b, l: (l,) + (0,) * (len(shape) - 1))

    param_order = ['ln1_g', 'ln1_b', 'w_in', 'b_in', 'w_out', 'b_out',
                   'ln2_g', 'ln2_b', 'w_fc', 'b_fc', 'w_pr', 'b_pr']
    for name in param_order:
        inputs.append(params[name])
        in_specs.append(layer_spec(params[name]))

    kern = functools.partial(_transformer_kernel, width, heads, L, Lp, B,
                             has_user_mask)

    out = pl.pallas_call(
        kern,
        out_shape=jax.ShapeDtypeStruct((Np * Lp, D), jnp.float32),
        grid_spec=pltpu.PrefetchScalarGridSpec(
            num_scalar_prefetch=0,
            grid=(NB, layers),
            in_specs=in_specs,
            out_specs=pl.BlockSpec((B * Lp, D), lambda b, l: (b, 0)),
            scratch_shapes=[pltpu.VMEM((B * Lp, D), jnp.float32),   # activation
                            pltpu.VMEM((B * Lp, D), jnp.float32)],  # attn context
        ),
        compiler_params=pltpu.CompilerParams(
            dimension_semantics=("parallel", "arbitrary"),
            vmem_limit_bytes=_vmem_limit_bytes(B, Lp, D)),
    )(*inputs)

    out = out.reshape(Np, Lp, D)[:N, :L, :]
    return jnp.transpose(out, (1, 0, 2))


def transformer_reference(x_lnd, params, width, heads, attn_mask=None):
    """Pure-JAX reference mirroring the kernel numerics (bf16 matmul inputs)."""
    f32, bf16 = jnp.float32, jnp.bfloat16
    L, N, D = x_lnd.shape
    hd = D // heads
    layers = params['w_in'].shape[0]
    x = jnp.transpose(x_lnd, (1, 0, 2)).astype(f32)
    mask = None
    if attn_mask is not None:
        m = jnp.asarray(attn_mask)
        mask = (jnp.where(m, -1e9, 0.0) if m.dtype == jnp.bool_ else m).astype(f32)

    def ln(v, g, b):
        mu = jnp.mean(v, -1, keepdims=True)
        var = jnp.mean((v - mu) ** 2, -1, keepdims=True)
        return (v - mu) * jax.lax.rsqrt(var + LN_EPS) * g + b

    for l in range(layers):
        h = ln(x, params['ln1_g'][l], params['ln1_b'][l])
        qkv = jnp.einsum('nld,de->nle', h.astype(bf16), params['w_in'][l],
                         preferred_element_type=f32) + params['b_in'][l]
        q, k, v = jnp.split(qkv, 3, axis=-1)
        q = q.reshape(N, L, heads, hd)
        k = k.reshape(N, L, heads, hd)
        v = v.reshape(N, L, heads, hd)
        s = jnp.einsum('nqhd,nkhd->nhqk', q.astype(bf16), k.astype(bf16),
                       preferred_element_type=f32)
        if mask is not None:
            s = s + mask
        p = jax.nn.softmax(s, axis=-1)
        ctx = jnp.einsum('nhqk,nkhd->nqhd', p.astype(bf16), v.astype(bf16),
                         preferred_element_type=f32).reshape(N, L, D)
        attn = jnp.einsum('nld,de->nle', ctx.astype(bf16), params['w_out'][l],
                          preferred_element_type=f32) + params['b_out'][l]
        x = x + attn
        h2 = ln(x, params['ln2_g'][l], params['ln2_b'][l])
        fc = jnp.einsum('nld,de->nle', h2.astype(bf16), params['w_fc'][l],
                        preferred_element_type=f32) + params['b_fc'][l]
        fc = fc * jax.nn.sigmoid(1.702 * fc)
        mlp = jnp.einsum('nld,de->nle', fc.astype(bf16), params['w_pr'][l],
                         preferred_element_type=f32) + params['b_pr'][l]
        x = x + mlp
    return jnp.transpose(x, (1, 0, 2))


if __name__ == "__main__":
    width, layers, heads = 32, 2, 4
    seq, batch = 8, 2

    key = jax.random.PRNGKey(0)
    kx, kp = jax.random.split(key)
    x = jax.random.normal(kx, (seq, batch, width), jnp.float32)
    params = init_transformer_params(kp, width, layers, heads)

    # No user mask (exercises the in-kernel padded-key masking path).
    out = jax.block_until_ready(transformer_forward(x, params, width, heads))
    assert out.shape == (seq, batch, width)
    assert bool(jnp.all(jnp.isfinite(out)))
    ref = transformer_reference(x, params, width, heads)
    err = float(jnp.max(jnp.abs(out - ref)))
    assert err < 5e-2, f"no-mask mismatch: {err}"

    # Causal additive mask (exercises the user-mask path).
    causal = jnp.where(jnp.tril(jnp.ones((seq, seq), bool)), 0.0, -1e9
                       ).astype(jnp.float32)
    out_m = jax.block_until_ready(
        transformer_forward(x, params, width, heads, attn_mask=causal))
    ref_m = transformer_reference(x, params, width, heads, attn_mask=causal)
    err_m = float(jnp.max(jnp.abs(out_m - ref_m)))
    assert out_m.shape == (seq, batch, width)
    assert bool(jnp.all(jnp.isfinite(out_m)))
    assert err_m < 5e-2, f"masked mismatch: {err_m}"

    print("KERNEL_OK")
</pallas_src>

<mosaic_0001>
module attributes {stable_mosaic.version = 11 : i64} {
  func.func @_transformer_kernel(%arg0: i32, %arg1: i32, %arg2: memref<32x32xf32, #tpu.memory_space<vmem>>, %arg3: memref<1x1x32xf32, #tpu.memory_space<vmem>>, %arg4: memref<1x1x32xf32, #tpu.memory_space<vmem>>, %arg5: memref<1x32x96xbf16, #tpu.memory_space<vmem>>, %arg6: memref<1x1x96xf32, #tpu.memory_space<vmem>>, %arg7: memref<1x32x32xbf16, #tpu.memory_space<vmem>>, %arg8: memref<1x1x32xf32, #tpu.memory_space<vmem>>, %arg9: memref<1x1x32xf32, #tpu.memory_space<vmem>>, %arg10: memref<1x1x32xf32, #tpu.memory_space<vmem>>, %arg11: memref<1x32x128xbf16, #tpu.memory_space<vmem>>, %arg12: memref<1x1x128xf32, #tpu.memory_space<vmem>>, %arg13: memref<1x128x32xbf16, #tpu.memory_space<vmem>>, %arg14: memref<1x1x32xf32, #tpu.memory_space<vmem>>, %arg15: memref<32x32xf32, #tpu.memory_space<vmem>>, %arg16: memref<32x32xf32, #tpu.memory_space<vmem>>, %arg17: memref<32x32xf32, #tpu.memory_space<vmem>>) attributes {dimension_semantics = [#tpu.dimension_semantics<parallel>, #tpu.dimension_semantics<arbitrary>], iteration_bounds = array<i64: 1, 2>, scalar_prefetch = 0 : i64, scratch_operands = 2 : i64, tpu.core_type = #tpu.core_type<tc>, window_params = [{transform_indices = @transform_0, window_bounds = array<i64: 32, 32>}, {transform_indices = @transform_1, window_bounds = array<i64: 1, 1, 32>}, {transform_indices = @transform_2, window_bounds = array<i64: 1, 1, 32>}, {transform_indices = @transform_3, window_bounds = array<i64: 1, 32, 96>}, {transform_indices = @transform_4, window_bounds = array<i64: 1, 1, 96>}, {transform_indices = @transform_5, window_bounds = array<i64: 1, 32, 32>}, {transform_indices = @transform_6, window_bounds = array<i64: 1, 1, 32>}, {transform_indices = @transform_7, window_bounds = array<i64: 1, 1, 32>}, {transform_indices = @transform_8, window_bounds = array<i64: 1, 1, 32>}, {transform_indices = @transform_9, window_bounds = array<i64: 1, 32, 128>}, {transform_indices = @transform_10, window_bounds = array<i64: 1, 1, 128>}, {transform_indices = @transform_11, window_bounds = array<i64: 1, 128, 32>}, {transform_indices = @transform_12, window_bounds = array<i64: 1, 1, 32>}, {transform_indices = @transform_13, window_bounds = array<i64: 32, 32>}]} {
    %c0_i32 = arith.constant 0 : i32
    %0 = arith.cmpi eq, %arg1, %c0_i32 : i32
    %1 = arith.extui %0 : i1 to i32
    %c0_i32_0 = arith.constant 0 : i32
    %2 = arith.cmpi ne, %1, %c0_i32_0 : i32
    scf.if %2 {
      %c0_105 = arith.constant 0 : index
      %c0_106 = arith.constant 0 : index
      %280 = vector.load %arg2[%c0_105, %c0_106] : memref<32x32xf32, #tpu.memory_space<vmem>>, vector<32x32xf32>
      %c0_107 = arith.constant 0 : index
      %c0_108 = arith.constant 0 : index
      %281 = vector.load %arg16[%c0_107, %c0_108] : memref<32x32xf32, #tpu.memory_space<vmem>>, vector<32x32xf32>
      tpu.vector_store %arg16[%c0_107, %c0_108], %280 {strides = array<i32>} : memref<32x32xf32, #tpu.memory_space<vmem>>, vector<32x32xf32>,
    } else {
    }
    %c0 = arith.constant 0 : index
    %c0_1 = arith.constant 0 : index
    %3 = vector.load %arg16[%c0, %c0_1] : memref<32x32xf32, #tpu.memory_space<vmem>>, vector<32x32xf32>
    %c0_2 = arith.constant 0 : index
    %c0_3 = arith.constant 0 : index
    %c0_4 = arith.constant 0 : index
    %4 = vector.load %arg3[%c0_2, %c0_3, %c0_4] : memref<1x1x32xf32, #tpu.memory_space<vmem>>, vector<1x1x32xf32>
    %5 = vector.shape_cast %4 : vector<1x1x32xf32> to vector<1x32xf32>
    %c0_5 = arith.constant 0 : index
    %c0_6 = arith.constant 0 : index
    %c0_7 = arith.constant 0 : index
    %6 = vector.load %arg4[%c0_5, %c0_6, %c0_7] : memref<1x1x32xf32, #tpu.memory_space<vmem>>, vector<1x1x32xf32>
    %7 = vector.shape_cast %6 : vector<1x1x32xf32> to vector<1x32xf32>
    %cst = arith.constant dense<0.000000e+00> : vector<32xf32>
    %8 = vector.multi_reduction <add>, %3, %cst [1] : vector<32x32xf32> to vector<32xf32>
    %9 = vector.shape_cast %8 : vector<32xf32> to vector<32x1xf32>
    %cst_8 = arith.constant 3.200000e+01 : f32
    %10 = vector.broadcast %cst_8 : f32 to vector<32x1xf32>
    %11 = arith.divf %9, %10 : vector<32x1xf32>
    %12 = vector.broadcast %11 : vector<32x1xf32> to vector<32x32xf32>
    %13 = arith.subf %3, %12 : vector<32x32xf32>
    %14 = arith.mulf %13, %13 : vector<32x32xf32>
    %cst_9 = arith.constant dense<0.000000e+00> : vector<32xf32>
    %15 = vector.multi_reduction <add>, %14, %cst_9 [1] : vector<32x32xf32> to vector<32xf32>
    %16 = vector.shape_cast %15 : vector<32xf32> to vector<32x1xf32>
    %cst_10 = arith.constant 3.200000e+01 : f32
    %17 = vector.broadcast %cst_10 : f32 to vector<32x1xf32>
    %18 = arith.divf %16, %17 : vector<32x1xf32>
    %19 = vector.broadcast %11 : vector<32x1xf32> to vector<32x32xf32>
    %20 = arith.subf %3, %19 : vector<32x32xf32>
    %cst_11 = arith.constant 9.99999974E-6 : f32
    %21 = vector.broadcast %cst_11 : f32 to vector<32x1xf32>
    %22 = arith.addf %18, %21 : vector<32x1xf32>
    %23 = math.rsqrt %22 : vector<32x1xf32>
    %24 = vector.broadcast %23 : vector<32x1xf32> to vector<32x32xf32>
    %25 = arith.mulf %20, %24 : vector<32x32xf32>
    %26 = vector.broadcast %5 : vector<1x32xf32> to vector<32x32xf32>
    %27 = arith.mulf %25, %26 : vector<32x32xf32>
    %28 = vector.broadcast %7 : vector<1x32xf32> to vector<32x32xf32>
    %29 = arith.addf %27, %28 : vector<32x32xf32>
    %30 = arith.truncf %29 : vector<32x32xf32> to vector<32x32xbf16>
    %c0_12 = arith.constant 0 : index
    %c0_13 = arith.constant 0 : index
    %c0_14 = arith.constant 0 : index
    %31 = vector.load %arg5[%c0_12, %c0_13, %c0_14] : memref<1x32x96xbf16, #tpu.memory_space<vmem>>, vector<1x32x96xbf16>
    %32 = vector.shape_cast %31 : vector<1x32x96xbf16> to vector<32x96xbf16>
    %cst_15 = arith.constant dense<0.000000e+00> : vector<32x96xf32>
    %33 = tpu.matmul %30, %32, %cst_15 {dimension_numbers = #tpu.dot_dimension_numbers<[1], [0], [0], [1], [0, 0, 1, 1], [], []>} : vector<32x32xbf16>, vector<32x96xbf16>, vector<32x96xf32> -> vector<32x96xf32>
    %c0_16 = arith.constant 0 : index
    %c0_17 = arith.constant 0 : index
    %c0_18 = arith.constant 0 : index
    %34 = vector.load %arg6[%c0_16, %c0_17, %c0_18] : memref<1x1x96xf32, #tpu.memory_space<vmem>>, vector<1x1x96xf32>
    %35 = vector.shape_cast %34 : vector<1x1x96xf32> to vector<1x96xf32>
    %36 = vector.broadcast %35 : vector<1x96xf32> to vector<32x96xf32>
    %37 = arith.addf %33, %36 : vector<32x96xf32>
    %38 = vector.extract_strided_slice %37 {offsets = [0, 0], sizes = [32, 32], strides = [1, 1]} : vector<32x96xf32> to vector<32x32xf32>
    %39 = vector.extract_strided_slice %37 {offsets = [0, 32], sizes = [32, 32], strides = [1, 1]} : vector<32x96xf32> to vector<32x32xf32>
    %40 = vector.extract_strided_slice %37 {offsets = [0, 64], sizes = [32, 32], strides = [1, 1]} : vector<32x96xf32> to vector<32x32xf32>
    %41 = tpu.iota {dimensions = array<i32: 1>} : vector<16x16xi32>
    %c8_i32 = arith.constant 8 : i32
    %42 = vector.broadcast %c8_i32 : i32 to vector<16x16xi32>
    %43 = arith.cmpi sge, %41, %42 : vector<16x16xi32>
    %cst_19 = arith.constant -1.000000e+09 : f32
    %cst_20 = arith.constant 0.000000e+00 : f32
    %44 = vector.broadcast %cst_19 : f32 to vector<16x16xf32>
    %45 = vector.broadcast %cst_20 : f32 to vector<16x16xf32>
    %46 = arith.select %43, %44, %45 : vector<16x16xi1>, vector<16x16xf32>
    %47 = vector.extract_strided_slice %38 {offsets = [0, 0], sizes = [16, 8], strides = [1, 1]} : vector<32x32xf32> to vector<16x8xf32>
    %48 = arith.truncf %47 : vector<16x8xf32> to vector<16x8xbf16>
    %49 = vector.extract_strided_slice %39 {offsets = [0, 0], sizes = [16, 8], strides = [1, 1]} : vector<32x32xf32> to vector<16x8xf32>
    %50 = arith.truncf %49 : vector<16x8xf32> to vector<16x8xbf16>
    %51 = vector.extract_strided_slice %40 {offsets = [0, 0], sizes = [16, 8], strides = [1, 1]} : vector<32x32xf32> to vector<16x8xf32>
    %52 = arith.truncf %51 : vector<16x8xf32> to vector<16x8xbf16>
    %cst_21 = arith.constant dense<0.000000e+00> : vector<16x16xf32>
    %53 = tpu.matmul %48, %50, %cst_21 {dimension_numbers = #tpu.dot_dimension_numbers<[1], [1], [0], [0], [0, 0, 1, 0], [], []>} : vector<16x8xbf16>, vector<16x8xbf16>, vector<16x16xf32> -> vector<16x16xf32>
    %54 = arith.addf %53, %46 : vector<16x16xf32>
    %cst_22 = arith.constant dense<0xFF800000> : vector<16xf32>
    %55 = vector.multi_reduction <maximumf>, %54, %cst_22 [1] : vector<16x16xf32> to vector<16xf32>
    %56 = vector.shape_cast %55 : vector<16xf32> to vector<16x1xf32>
    %57 = vector.broadcast %56 : vector<16x1xf32> to vector<16x16xf32>
    %58 = arith.subf %54, %57 : vector<16x16xf32>
    %59 = math.exp %58 : vector<16x16xf32>
    %cst_23 = arith.constant dense<0.000000e+00> : vector<16xf32>
    %60 = vector.multi_reduction <add>, %59, %cst_23 [1] : vector<16x16xf32> to vector<16xf32>
    %61 = vector.shape_cast %60 : vector<16xf32> to vector<16x1xf32>
    %62 = tpu.reciprocal %61 {approx = true} : vector<16x1xf32> -> vector<16x1xf32>
    %63 = vector.broadcast %62 : vector<16x1xf32> to vector<16x16xf32>
    %64 = arith.mulf %59, %63 : vector<16x16xf32>
    %65 = arith.truncf %64 : vector<16x16xf32> to vector<16x16xbf16>
    %cst_24 = arith.constant dense<0.000000e+00> : vector<16x8xf32>
    %66 = tpu.matmul %65, %52, %cst_24 {dimension_numbers = #tpu.dot_dimension_numbers<[1], [0], [0], [1], [0, 0, 1, 1], [], []>} : vector<16x16xbf16>, vector<16x8xbf16>, vector<16x8xf32> -> vector<16x8xf32>
    %c0_25 = arith.constant 0 : index
    %c0_26 = arith.constant 0 : index
    %67 = vector.load %arg17[%c0_25, %c0_26] : memref<32x32xf32, #tpu.memory_space<vmem>>, vector<16x8xf32>
    tpu.vector_store %arg17[%c0_25, %c0_26], %66 {strides = array<i32>} : memref<32x32xf32, #tpu.memory_space<vmem>>, vector<16x8xf32>,
    %68 = vector.extract_strided_slice %38 {offsets = [0, 8], sizes = [16, 8], strides = [1, 1]} : vector<32x32xf32> to vector<16x8xf32>
    %69 = arith.truncf %68 : vector<16x8xf32> to vector<16x8xbf16>
    %70 = vector.extract_strided_slice %39 {offsets = [0, 8], sizes = [16, 8], strides = [1, 1]} : vector<32x32xf32> to vector<16x8xf32>
    %71 = arith.truncf %70 : vector<16x8xf32> to vector<16x8xbf16>
    %72 = vector.extract_strided_slice %40 {offsets = [0, 8], sizes = [16, 8], strides = [1, 1]} : vector<32x32xf32> to vector<16x8xf32>
    %73 = arith.truncf %72 : vector<16x8xf32> to vector<16x8xbf16>
    %cst_27 = arith.constant dense<0.000000e+00> : vector<16x16xf32>
    %74 = tpu.matmul %69, %71, %cst_27 {dimension_numbers = #tpu.dot_dimension_numbers<[1], [1], [0], [0], [0, 0, 1, 0], [], []>} : vector<16x8xbf16>, vector<16x8xbf16>, vector<16x16xf32> -> vector<16x16xf32>
    %75 = arith.addf %74, %46 : vector<16x16xf32>
    %cst_28 = arith.constant dense<0xFF800000> : vector<16xf32>
    %76 = vector.multi_reduction <maximumf>, %75, %cst_28 [1] : vector<16x16xf32> to vector<16xf32>
    %77 = vector.shape_cast %76 : vector<16xf32> to vector<16x1xf32>
    %78 = vector.broadcast %77 : vector<16x1xf32> to vector<16x16xf32>
    %79 = arith.subf %75, %78 : vector<16x16xf32>
    %80 = math.exp %79 : vector<16x16xf32>
    %cst_29 = arith.constant dense<0.000000e+00> : vector<16xf32>
    %81 = vector.multi_reduction <add>, %80, %cst_29 [1] : vector<16x16xf32> to vector<16xf32>
    %82 = vector.shape_cast %81 : vector<16xf32> to vector<16x1xf32>
    %83 = tpu.reciprocal %82 {approx = true} : vector<16x1xf32> -> vector<16x1xf32>
    %84 = vector.broadcast %83 : vector<16x1xf32> to vector<16x16xf32>
    %85 = arith.mulf %80, %84 : vector<16x16xf32>
    %86 = arith.truncf %85 : vector<16x16xf32> to vector<16x16xbf16>
    %cst_30 = arith.constant dense<0.000000e+00> : vector<16x8xf32>
    %87 = tpu.matmul %86, %73, %cst_30 {dimension_numbers = #tpu.dot_dimension_numbers<[1], [0], [0], [1], [0, 0, 1, 1], [], []>} : vector<16x16xbf16>, vector<16x8xbf16>, vector<16x8xf32> -> vector<16x8xf32>
    %c0_31 = arith.constant 0 : index
    %c8 = arith.constant 8 : index
    %88 = vector.load %arg17[%c0_31, %c8] : memref<32x32xf32, #tpu.memory_space<vmem>>, vector<16x8xf32>
    tpu.vector_store %arg17[%c0_31, %c8], %87 {strides = array<i32>} : memref<32x32xf32, #tpu.memory_space<vmem>>, vector<16x8xf32>,
    %89 = vector.extract_strided_slice %38 {offsets = [0, 16], sizes = [16, 8], strides = [1, 1]} : vector<32x32xf32> to vector<16x8xf32>
    %90 = arith.truncf %89 : vector<16x8xf32> to vector<16x8xbf16>
    %91 = vector.extract_strided_slice %39 {offsets = [0, 16], sizes = [16, 8], strides = [1, 1]} : vector<32x32xf32> to vector<16x8xf32>
    %92 = arith.truncf %91 : vector<16x8xf32> to vector<16x8xbf16>
    %93 = vector.extract_strided_slice %40 {offsets = [0, 16], sizes = [16, 8], strides = [1, 1]} : vector<32x32xf32> to vector<16x8xf32>
    %94 = arith.truncf %93 : vector<16x8xf32> to vector<16x8xbf16>
    %cst_32 = arith.constant dense<0.000000e+00> : vector<16x16xf32>
    %95 = tpu.matmul %90, %92, %cst_32 {dimension_numbers = #tpu.dot_dimension_numbers<[1], [1], [0], [0], [0, 0, 1, 0], [], []>} : vector<16x8xbf16>, vector<16x8xbf16>, vector<16x16xf32> -> vector<16x16xf32>
    %96 = arith.addf %95, %46 : vector<16x16xf32>
    %cst_33 = arith.constant dense<0xFF800000> : vector<16xf32>
    %97 = vector.multi_reduction <maximumf>, %96, %cst_33 [1] : vector<16x16xf32> to vector<16xf32>
    %98 = vector.shape_cast %97 : vector<16xf32> to vector<16x1xf32>
    %99 = vector.broadcast %98 : vector<16x1xf32> to vector<16x16xf32>
    %100 = arith.subf %96, %99 : vector<16x16xf32>
    %101 = math.exp %100 : vector<16x16xf32>
    %cst_34 = arith.constant dense<0.000000e+00> : vector<16xf32>
    %102 = vector.multi_reduction <add>, %101, %cst_34 [1] : vector<16x16xf32> to vector<16xf32>
    %103 = vector.shape_cast %102 : vector<16xf32> to vector<16x1xf32>
    %104 = tpu.reciprocal %103 {approx = true} : vector<16x1xf32> -> vector<16x1xf32>
    %105 = vector.broadcast %104 : vector<16x1xf32> to vector<16x16xf32>
    %106 = arith.mulf %101, %105 : vector<16x16xf32>
    %107 = arith.truncf %106 : vector<16x16xf32> to vector<16x16xbf16>
    %cst_35 = arith.constant dense<0.000000e+00> : vector<16x8xf32>
    %108 = tpu.matmul %107, %94, %cst_35 {dimension_numbers = #tpu.dot_dimension_numbers<[1], [0], [0], [1], [0, 0, 1, 1], [], []>} : vector<16x16xbf16>, vector<16x8xbf16>, vector<16x8xf32> -> vector<16x8xf32>
    %c0_36 = arith.constant 0 : index
    %c16 = arith.constant 16 : index
    %109 = vector.load %arg17[%c0_36, %c16] : memref<32x32xf32, #tpu.memory_space<vmem>>, vector<16x8xf32>
    tpu.vector_store %arg17[%c0_36, %c16], %108 {strides = array<i32>} : memref<32x32xf32, #tpu.memory_space<vmem>>, vector<16x8xf32>,
    %110 = vector.extract_strided_slice %38 {offsets = [0, 24], sizes = [16, 8], strides = [1, 1]} : vector<32x32xf32> to vector<16x8xf32>
    %111 = arith.truncf %110 : vector<16x8xf32> to vector<16x8xbf16>
    %112 = vector.extract_strided_slice %39 {offsets = [0, 24], sizes = [16, 8], strides = [1, 1]} : vector<32x32xf32> to vector<16x8xf32>
    %113 = arith.truncf %112 : vector<16x8xf32> to vector<16x8xbf16>
    %114 = vector.extract_strided_slice %40 {offsets = [0, 24], sizes = [16, 8], strides = [1, 1]} : vector<32x32xf32> to vector<16x8xf32>
    %115 = arith.truncf %114 : vector<16x8xf32> to vector<16x8xbf16>
    %cst_37 = arith.constant dense<0.000000e+00> : vector<16x16xf32>
    %116 = tpu.matmul %111, %113, %cst_37 {dimension_numbers = #tpu.dot_dimension_numbers<[1], [1], [0], [0], [0, 0, 1, 0], [], []>} : vector<16x8xbf16>, vector<16x8xbf16>, vector<16x16xf32> -> vector<16x16xf32>
    %117 = arith.addf %116, %46 : vector<16x16xf32>
    %cst_38 = arith.constant dense<0xFF800000> : vector<16xf32>
    %118 = vector.multi_reduction <maximumf>, %117, %cst_38 [1] : vector<16x16xf32> to vector<16xf32>
    %119 = vector.shape_cast %118 : vector<16xf32> to vector<16x1xf32>
    %120 = vector.broadcast %119 : vector<16x1xf32> to vector<16x16xf32>
    %121 = arith.subf %117, %120 : vector<16x16xf32>
    %122 = math.exp %121 : vector<16x16xf32>
    %cst_39 = arith.constant dense<0.000000e+00> : vector<16xf32>
    %123 = vector.multi_reduction <add>, %122, %cst_39 [1] : vector<16x16xf32> to vector<16xf32>
    %124 = vector.shape_cast %123 : vector<16xf32> to vector<16x1xf32>
    %125 = tpu.reciprocal %124 {approx = true} : vector<16x1xf32> -> vector<16x1xf32>
    %126 = vector.broadcast %125 : vector<16x1xf32> to vector<16x16xf32>
    %127 = arith.mulf %122, %126 : vector<16x16xf32>
    %128 = arith.truncf %127 : vector<16x16xf32> to vector<16x16xbf16>
    %cst_40 = arith.constant dense<0.000000e+00> : vector<16x8xf32>
    %129 = tpu.matmul %128, %115, %cst_40 {dimension_numbers = #tpu.dot_dimension_numbers<[1], [0], [0], [1], [0, 0, 1, 1], [], []>} : vector<16x16xbf16>, vector<16x8xbf16>, vector<16x8xf32> -> vector<16x8xf32>
    %c0_41 = arith.constant 0 : index
    %c24 = arith.constant 24 : index
    %130 = vector.load %arg17[%c0_41, %c24] : memref<32x32xf32, #tpu.memory_space<vmem>>, vector<16x8xf32>
    tpu.vector_store %arg17[%c0_41, %c24], %129 {strides = array<i32>} : memref<32x32xf32, #tpu.memory_space<vmem>>, vector<16x8xf32>,
    %131 = vector.extract_strided_slice %38 {offsets = [16, 0], sizes = [16, 8], strides = [1, 1]} : vector<32x32xf32> to vector<16x8xf32>
    %132 = arith.truncf %131 : vector<16x8xf32> to vector<16x8xbf16>
    %133 = vector.extract_strided_slice %39 {offsets = [16, 0], sizes = [16, 8], strides = [1, 1]} : vector<32x32xf32> to vector<16x8xf32>
    %134 = arith.truncf %133 : vector<16x8xf32> to vector<16x8xbf16>
    %135 = vector.extract_strided_slice %40 {offsets = [16, 0], sizes = [16, 8], strides = [1, 1]} : vector<32x32xf32> to vector<16x8xf32>
    %136 = arith.truncf %135 : vector<16x8xf32> to vector<16x8xbf16>
    %cst_42 = arith.constant dense<0.000000e+00> : vector<16x16xf32>
    %137 = tpu.matmul %132, %134, %cst_42 {dimension_numbers = #tpu.dot_dimension_numbers<[1], [1], [0], [0], [0, 0, 1, 0], [], []>} : vector<16x8xbf16>, vector<16x8xbf16>, vector<16x16xf32> -> vector<16x16xf32>
    %138 = arith.addf %137, %46 : vector<16x16xf32>
    %cst_43 = arith.constant dense<0xFF800000> : vector<16xf32>
    %139 = vector.multi_reduction <maximumf>, %138, %cst_43 [1] : vector<16x16xf32> to vector<16xf32>
    %140 = vector.shape_cast %139 : vector<16xf32> to vector<16x1xf32>
    %141 = vector.broadcast %140 : vector<16x1xf32> to vector<16x16xf32>
    %142 = arith.subf %138, %141 : vector<16x16xf32>
    %143 = math.exp %142 : vector<16x16xf32>
    %cst_44 = arith.constant dense<0.000000e+00> : vector<16xf32>
    %144 = vector.multi_reduction <add>, %143, %cst_44 [1] : vector<16x16xf32> to vector<16xf32>
    %145 = vector.shape_cast %144 : vector<16xf32> to vector<16x1xf32>
    %146 = tpu.reciprocal %145 {approx = true} : vector<16x1xf32> -> vector<16x1xf32>
    %147 = vector.broadcast %146 : vector<16x1xf32> to vector<16x16xf32>
    %148 = arith.mulf %143, %147 : vector<16x16xf32>
    %149 = arith.truncf %148 : vector<16x16xf32> to vector<16x16xbf16>
    %cst_45 = arith.constant dense<0.000000e+00> : vector<16x8xf32>
    %150 = tpu.matmul %149, %136, %cst_45 {dimension_numbers = #tpu.dot_dimension_numbers<[1], [0], [0], [1], [0, 0, 1, 1], [], []>} : vector<16x16xbf16>, vector<16x8xbf16>, vector<16x8xf32> -> vector<16x8xf32>
    %c16_46 = arith.constant 16 : index
    %c0_47 = arith.constant 0 : index
    %151 = vector.load %arg17[%c16_46, %c0_47] : memref<32x32xf32, #tpu.memory_space<vmem>>, vector<16x8xf32>
    tpu.vector_store %arg17[%c16_46, %c0_47], %150 {strides = array<i32>} : memref<32x32xf32, #tpu.memory_space<vmem>>, vector<16x8xf32>,
    %152 = vector.extract_strided_slice %38 {offsets = [16, 8], sizes = [16, 8], strides = [1, 1]} : vector<32x32xf32> to vector<16x8xf32>
    %153 = arith.truncf %152 : vector<16x8xf32> to vector<16x8xbf16>
    %154 = vector.extract_strided_slice %39 {offsets = [16, 8], sizes = [16, 8], strides = [1, 1]} : vector<32x32xf32> to vector<16x8xf32>
    %155 = arith.truncf %154 : vector<16x8xf32> to vector<16x8xbf16>
    %156 = vector.extract_strided_slice %40 {offsets = [16, 8], sizes = [16, 8], strides = [1, 1]} : vector<32x32xf32> to vector<16x8xf32>
    %157 = arith.truncf %156 : vector<16x8xf32> to vector<16x8xbf16>
    %cst_48 = arith.constant dense<0.000000e+00> : vector<16x16xf32>
    %158 = tpu.matmul %153, %155, %cst_48 {dimension_numbers = #tpu.dot_dimension_numbers<[1], [1], [0], [0], [0, 0, 1, 0], [], []>} : vector<16x8xbf16>, vector<16x8xbf16>, vector<16x16xf32> -> vector<16x16xf32>
    %159 = arith.addf %158, %46 : vector<16x16xf32>
    %cst_49 = arith.constant dense<0xFF800000> : vector<16xf32>
    %160 = vector.multi_reduction <maximumf>, %159, %cst_49 [1] : vector<16x16xf32> to vector<16xf32>
    %161 = vector.shape_cast %160 : vector<16xf32> to vector<16x1xf32>
    %162 = vector.broadcast %161 : vector<16x1xf32> to vector<16x16xf32>
    %163 = arith.subf %159, %162 : vector<16x16xf32>
    %164 = math.exp %163 : vector<16x16xf32>
    %cst_50 = arith.constant dense<0.000000e+00> : vector<16xf32>
    %165 = vector.multi_reduction <add>, %164, %cst_50 [1] : vector<16x16xf32> to vector<16xf32>
    %166 = vector.shape_cast %165 : vector<16xf32> to vector<16x1xf32>
    %167 = tpu.reciprocal %166 {approx = true} : vector<16x1xf32> -> vector<16x1xf32>
    %168 = vector.broadcast %167 : vector<16x1xf32> to vector<16x16xf32>
    %169 = arith.mulf %164, %168 : vector<16x16xf32>
    %170 = arith.truncf %169 : vector<16x16xf32> to vector<16x16xbf16>
    %cst_51 = arith.constant dense<0.000000e+00> : vector<16x8xf32>
    %171 = tpu.matmul %170, %157, %cst_51 {dimension_numbers = #tpu.dot_dimension_numbers<[1], [0], [0], [1], [0, 0, 1, 1], [], []>} : vector<16x16xbf16>, vector<16x8xbf16>, vector<16x8xf32> -> vector<16x8xf32>
    %c16_52 = arith.constant 16 : index
    %c8_53 = arith.constant 8 : index
    %172 = vector.load %arg17[%c16_52, %c8_53] : memref<32x32xf32, #tpu.memory_space<vmem>>, vector<16x8xf32>
    tpu.vector_store %arg17[%c16_52, %c8_53], %171 {strides = array<i32>} : memref<32x32xf32, #tpu.memory_space<vmem>>, vector<16x8xf32>,
    %173 = vector.extract_strided_slice %38 {offsets = [16, 16], sizes = [16, 8], strides = [1, 1]} : vector<32x32xf32> to vector<16x8xf32>
    %174 = arith.truncf %173 : vector<16x8xf32> to vector<16x8xbf16>
    %175 = vector.extract_strided_slice %39 {offsets = [16, 16], sizes = [16, 8], strides = [1, 1]} : vector<32x32xf32> to vector<16x8xf32>
    %176 = arith.truncf %175 : vector<16x8xf32> to vector<16x8xbf16>
    %177 = vector.extract_strided_slice %40 {offsets = [16, 16], sizes = [16, 8], strides = [1, 1]} : vector<32x32xf32> to vector<16x8xf32>
    %178 = arith.truncf %177 : vector<16x8xf32> to vector<16x8xbf16>
    %cst_54 = arith.constant dense<0.000000e+00> : vector<16x16xf32>
    %179 = tpu.matmul %174, %176, %cst_54 {dimension_numbers = #tpu.dot_dimension_numbers<[1], [1], [0], [0], [0, 0, 1, 0], [], []>} : vector<16x8xbf16>, vector<16x8xbf16>, vector<16x16xf32> -> vector<16x16xf32>
    %180 = arith.addf %179, %46 : vector<16x16xf32>
    %cst_55 = arith.constant dense<0xFF800000> : vector<16xf32>
    %181 = vector.multi_reduction <maximumf>, %180, %cst_55 [1] : vector<16x16xf32> to vector<16xf32>
    %182 = vector.shape_cast %181 : vector<16xf32> to vector<16x1xf32>
    %183 = vector.broadcast %182 : vector<16x1xf32> to vector<16x16xf32>
    %184 = arith.subf %180, %183 : vector<16x16xf32>
    %185 = math.exp %184 : vector<16x16xf32>
    %cst_56 = arith.constant dense<0.000000e+00> : vector<16xf32>
    %186 = vector.multi_reduction <add>, %185, %cst_56 [1] : vector<16x16xf32> to vector<16xf32>
    %187 = vector.shape_cast %186 : vector<16xf32> to vector<16x1xf32>
    %188 = tpu.reciprocal %187 {approx = true} : vector<16x1xf32> -> vector<16x1xf32>
    %189 = vector.broadcast %188 : vector<16x1xf32> to vector<16x16xf32>
    %190 = arith.mulf %185, %189 : vector<16x16xf32>
    %191 = arith.truncf %190 : vector<16x16xf32> to vector<16x16xbf16>
    %cst_57 = arith.constant dense<0.000000e+00> : vector<16x8xf32>
    %192 = tpu.matmul %191, %178, %cst_57 {dimension_numbers = #tpu.dot_dimension_numbers<[1], [0], [0], [1], [0, 0, 1, 1], [], []>} : vector<16x16xbf16>, vector<16x8xbf16>, vector<16x8xf32> -> vector<16x8xf32>
    %c16_58 = arith.constant 16 : index
    %c16_59 = arith.constant 16 : index
    %193 = vector.load %arg17[%c16_58, %c16_59] : memref<32x32xf32, #tpu.memory_space<vmem>>, vector<16x8xf32>
    tpu.vector_store %arg17[%c16_58, %c16_59], %192 {strides = array<i32>} : memref<32x32xf32, #tpu.memory_space<vmem>>, vector<16x8xf32>,
    %194 = vector.extract_strided_slice %38 {offsets = [16, 24], sizes = [16, 8], strides = [1, 1]} : vector<32x32xf32> to vector<16x8xf32>
    %195 = arith.truncf %194 : vector<16x8xf32> to vector<16x8xbf16>
    %196 = vector.extract_strided_slice %39 {offsets = [16, 24], sizes = [16, 8], strides = [1, 1]} : vector<32x32xf32> to vector<16x8xf32>
    %197 = arith.truncf %196 : vector<16x8xf32> to vector<16x8xbf16>
    %198 = vector.extract_strided_slice %40 {offsets = [16, 24], sizes = [16, 8], strides = [1, 1]} : vector<32x32xf32> to vector<16x8xf32>
    %199 = arith.truncf %198 : vector<16x8xf32> to vector<16x8xbf16>
    %cst_60 = arith.constant dense<0.000000e+00> : vector<16x16xf32>
    %200 = tpu.matmul %195, %197, %cst_60 {dimension_numbers = #tpu.dot_dimension_numbers<[1], [1], [0], [0], [0, 0, 1, 0], [], []>} : vector<16x8xbf16>, vector<16x8xbf16>, vector<16x16xf32> -> vector<16x16xf32>
    %201 = arith.addf %200, %46 : vector<16x16xf32>
    %cst_61 = arith.constant dense<0xFF800000> : vector<16xf32>
    %202 = vector.multi_reduction <maximumf>, %201, %cst_61 [1] : vector<16x16xf32> to vector<16xf32>
    %203 = vector.shape_cast %202 : vector<16xf32> to vector<16x1xf32>
    %204 = vector.broadcast %203 : vector<16x1xf32> to vector<16x16xf32>
    %205 = arith.subf %201, %204 : vector<16x16xf32>
    %206 = math.exp %205 : vector<16x16xf32>
    %cst_62 = arith.constant dense<0.000000e+00> : vector<16xf32>
    %207 = vector.multi_reduction <add>, %206, %cst_62 [1] : vector<16x16xf32> to vector<16xf32>
    %208 = vector.shape_cast %207 : vector<16xf32> to vector<16x1xf32>
    %209 = tpu.reciprocal %208 {approx = true} : vector<16x1xf32> -> vector<16x1xf32>
    %210 = vector.broadcast %209 : vector<16x1xf32> to vector<16x16xf32>
    %211 = arith.mulf %206, %210 : vector<16x16xf32>
    %212 = arith.truncf %211 : vector<16x16xf32> to vector<16x16xbf16>
    %cst_63 = arith.constant dense<0.000000e+00> : vector<16x8xf32>
    %213 = tpu.matmul %212, %199, %cst_63 {dimension_numbers = #tpu.dot_dimension_numbers<[1], [0], [0], [1], [0, 0, 1, 1], [], []>} : vector<16x16xbf16>, vector<16x8xbf16>, vector<16x8xf32> -> vector<16x8xf32>
    %c16_64 = arith.constant 16 : index
    %c24_65 = arith.constant 24 : index
    %214 = vector.load %arg17[%c16_64, %c24_65] : memref<32x32xf32, #tpu.memory_space<vmem>>, vector<16x8xf32>
    tpu.vector_store %arg17[%c16_64, %c24_65], %213 {strides = array<i32>} : memref<32x32xf32, #tpu.memory_space<vmem>>, vector<16x8xf32>,
    %c0_66 = arith.constant 0 : index
    %c0_67 = arith.constant 0 : index
    %215 = vector.load %arg17[%c0_66, %c0_67] : memref<32x32xf32, #tpu.memory_space<vmem>>, vector<32x32xf32>
    %216 = arith.truncf %215 : vector<32x32xf32> to vector<32x32xbf16>
    %c0_68 = arith.constant 0 : index
    %c0_69 = arith.constant 0 : index
    %c0_70 = arith.constant 0 : index
    %217 = vector.load %arg7[%c0_68, %c0_69, %c0_70] : memref<1x32x32xbf16, #tpu.memory_space<vmem>>, vector<1x32x32xbf16>
    %218 = vector.shape_cast %217 : vector<1x32x32xbf16> to vector<32x32xbf16>
    %cst_71 = arith.constant dense<0.000000e+00> : vector<32x32xf32>
    %219 = tpu.matmul %216, %218, %cst_71 {dimension_numbers = #tpu.dot_dimension_numbers<[1], [0], [0], [1], [0, 0, 1, 1], [], []>} : vector<32x32xbf16>, vector<32x32xbf16>, vector<32x32xf32> -> vector<32x32xf32>
    %c0_72 = arith.constant 0 : index
    %c0_73 = arith.constant 0 : index
    %c0_74 = arith.constant 0 : index
    %220 = vector.load %arg8[%c0_72, %c0_73, %c0_74] : memref<1x1x32xf32, #tpu.memory_space<vmem>>, vector<1x1x32xf32>
    %221 = vector.shape_cast %220 : vector<1x1x32xf32> to vector<1x32xf32>
    %222 = vector.broadcast %221 : vector<1x32xf32> to vector<32x32xf32>
    %223 = arith.addf %219, %222 : vector<32x32xf32>
    %224 = arith.addf %3, %223 : vector<32x32xf32>
    %c0_75 = arith.constant 0 : index
    %c0_76 = arith.constant 0 : index
    %c0_77 = arith.constant 0 : index
    %225 = vector.load %arg9[%c0_75, %c0_76, %c0_77] : memref<1x1x32xf32, #tpu.memory_space<vmem>>, vector<1x1x32xf32>
    %226 = vector.shape_cast %225 : vector<1x1x32xf32> to vector<1x32xf32>
    %c0_78 = arith.constant 0 : index
    %c0_79 = arith.constant 0 : index
    %c0_80 = arith.constant 0 : index
    %227 = vector.load %arg10[%c0_78, %c0_79, %c0_80] : memref<1x1x32xf32, #tpu.memory_space<vmem>>, vector<1x1x32xf32>
    %228 = vector.shape_cast %227 : vector<1x1x32xf32> to vector<1x32xf32>
    %cst_81 = arith.constant dense<0.000000e+00> : vector<32xf32>
    %229 = vector.multi_reduction <add>, %224, %cst_81 [1] : vector<32x32xf32> to vector<32xf32>
    %230 = vector.shape_cast %229 : vector<32xf32> to vector<32x1xf32>
    %cst_82 = arith.constant 3.200000e+01 : f32
    %231 = vector.broadcast %cst_82 : f32 to vector<32x1xf32>
    %232 = arith.divf %230, %231 : vector<32x1xf32>
    %233 = vector.broadcast %232 : vector<32x1xf32> to vector<32x32xf32>
    %234 = arith.subf %224, %233 : vector<32x32xf32>
    %235 = arith.mulf %234, %234 : vector<32x32xf32>
    %cst_83 = arith.constant dense<0.000000e+00> : vector<32xf32>
    %236 = vector.multi_reduction <add>, %235, %cst_83 [1] : vector<32x32xf32> to vector<32xf32>
    %237 = vector.shape_cast %236 : vector<32xf32> to vector<32x1xf32>
    %cst_84 = arith.constant 3.200000e+01 : f32
    %238 = vector.broadcast %cst_84 : f32 to vector<32x1xf32>
    %239 = arith.divf %237, %238 : vector<32x1xf32>
    %240 = vector.broadcast %232 : vector<32x1xf32> to vector<32x32xf32>
    %241 = arith.subf %224, %240 : vector<32x32xf32>
    %cst_85 = arith.constant 9.99999974E-6 : f32
    %242 = vector.broadcast %cst_85 : f32 to vector<32x1xf32>
    %243 = arith.addf %239, %242 : vector<32x1xf32>
    %244 = math.rsqrt %243 : vector<32x1xf32>
    %245 = vector.broadcast %244 : vector<32x1xf32> to vector<32x32xf32>
    %246 = arith.mulf %241, %245 : vector<32x32xf32>
    %247 = vector.broadcast %226 : vector<1x32xf32> to vector<32x32xf32>
    %248 = arith.mulf %246, %247 : vector<32x32xf32>
    %249 = vector.broadcast %228 : vector<1x32xf32> to vector<32x32xf32>
    %250 = arith.addf %248, %249 : vector<32x32xf32>
    %251 = arith.truncf %250 : vector<32x32xf32> to vector<32x32xbf16>
    %c0_86 = arith.constant 0 : index
    %c0_87 = arith.constant 0 : index
    %c0_88 = arith.constant 0 : index
    %252 = vector.load %arg11[%c0_86, %c0_87, %c0_88] : memref<1x32x128xbf16, #tpu.memory_space<vmem>>, vector<1x32x128xbf16>
    %253 = vector.shape_cast %252 : vector<1x32x128xbf16> to vector<32x128xbf16>
    %cst_89 = arith.constant dense<0.000000e+00> : vector<32x128xf32>
    %254 = tpu.matmul %251, %253, %cst_89 {dimension_numbers = #tpu.dot_dimension_numbers<[1], [0], [0], [1], [0, 0, 1, 1], [], []>} : vector<32x32xbf16>, vector<32x128xbf16>, vector<32x128xf32> -> vector<32x128xf32>
    %c0_90 = arith.constant 0 : index
    %c0_91 = arith.constant 0 : index
    %c0_92 = arith.constant 0 : index
    %255 = vector.load %arg12[%c0_90, %c0_91, %c0_92] : memref<1x1x128xf32, #tpu.memory_space<vmem>>, vector<1x1x128xf32>
    %256 = vector.shape_cast %255 : vector<1x1x128xf32> to vector<1x128xf32>
    %257 = vector.broadcast %256 : vector<1x128xf32> to vector<32x128xf32>
    %258 = arith.addf %254, %257 : vector<32x128xf32>
    %cst_93 = arith.constant 1.702000e+00 : f32
    %259 = vector.broadcast %cst_93 : f32 to vector<32x128xf32>
    %260 = arith.mulf %259, %258 : vector<32x128xf32>
    %261 = arith.negf %260 : vector<32x128xf32>
    %262 = math.exp %261 : vector<32x128xf32>
    %cst_94 = arith.constant 1.000000e+00 : f32
    %263 = vector.broadcast %cst_94 : f32 to vector<32x128xf32>
    %264 = arith.addf %263, %262 : vector<32x128xf32>
    %265 = arith.divf %263, %264 : vector<32x128xf32>
    %266 = arith.mulf %258, %265 : vector<32x128xf32>
    %267 = arith.truncf %266 : vector<32x128xf32> to vector<32x128xbf16>
    %c0_95 = arith.constant 0 : index
    %c0_96 = arith.constant 0 : index
    %c0_97 = arith.constant 0 : index
    %268 = vector.load %arg13[%c0_95, %c0_96, %c0_97] : memref<1x128x32xbf16, #tpu.memory_space<vmem>>, vector<1x128x32xbf16>
    %269 = vector.shape_cast %268 : vector<1x128x32xbf16> to vector<128x32xbf16>
    %cst_98 = arith.constant dense<0.000000e+00> : vector<32x32xf32>
    %270 = tpu.matmul %267, %269, %cst_98 {dimension_numbers = #tpu.dot_dimension_numbers<[1], [0], [0], [1], [0, 0, 1, 1], [], []>} : vector<32x128xbf16>, vector<128x32xbf16>, vector<32x32xf32> -> vector<32x32xf32>
    %c0_99 = arith.constant 0 : index
    %c0_100 = arith.constant 0 : index
    %c0_101 = arith.constant 0 : index
    %271 = vector.load %arg14[%c0_99, %c0_100, %c0_101] : memref<1x1x32xf32, #tpu.memory_space<vmem>>, vector<1x1x32xf32>
    %272 = vector.shape_cast %271 : vector<1x1x32xf32> to vector<1x32xf32>
    %273 = vector.broadcast %272 : vector<1x32xf32> to vector<32x32xf32>
    %274 = arith.addf %270, %273 : vector<32x32xf32>
    %275 = arith.addf %224, %274 : vector<32x32xf32>
    %c0_102 = arith.constant 0 : index
    %c0_103 = arith.constant 0 : index
    %276 = vector.load %arg16[%c0_102, %c0_103] : memref<32x32xf32, #tpu.memory_space<vmem>>, vector<32x32xf32>
    tpu.vector_store %arg16[%c0_102, %c0_103], %275 {strides = array<i32>} : memref<32x32xf32, #tpu.memory_space<vmem>>, vector<32x32xf32>,
    %c1_i32 = arith.constant 1 : i32
    %277 = arith.cmpi eq, %arg1, %c1_i32 : i32
    %278 = arith.extui %277 : i1 to i32
    %c0_i32_104 = arith.constant 0 : i32
    %279 = arith.cmpi ne, %278, %c0_i32_104 : i32
    scf.if %279 {
      %c0_105 = arith.constant 0 : index
      %c0_106 = arith.constant 0 : index
      %280 = vector.load %arg16[%c0_105, %c0_106] : memref<32x32xf32, #tpu.memory_space<vmem>>, vector<32x32xf32>
      %c0_107 = arith.constant 0 : index
      %c0_108 = arith.constant 0 : index
      %281 = vector.load %arg15[%c0_107, %c0_108] : memref<32x32xf32, #tpu.memory_space<vmem>>, vector<32x32xf32>
      tpu.vector_store %arg15[%c0_107, %c0_108], %280 {strides = array<i32>} : memref<32x32xf32, #tpu.memory_space<vmem>>, vector<32x32xf32>,
    } else {
    }
    return
  }
  func.func @transform_0(%arg0: i32, %arg1: i32) -> (i32, i32) {
    %c0_i32 = arith.constant 0 : i32
    %c0_i32_0 = arith.constant 0 : i32
    return %arg0, %c0_i32 : i32, i32
  }
  func.func @transform_1(%arg0: i32, %arg1: i32) -> (i32, i32, i32) {
    %c0_i32 = arith.constant 0 : i32
    %c0_i32_0 = arith.constant 0 : i32
    %c0_i32_1 = arith.constant 0 : i32
    return %arg1, %c0_i32, %c0_i32_0 : i32, i32, i32
  }
  func.func @transform_2(%arg0: i32, %arg1: i32) -> (i32, i32, i32) {
    %c0_i32 = arith.constant 0 : i32
    %c0_i32_0 = arith.constant 0 : i32
    %c0_i32_1 = arith.constant 0 : i32
    return %arg1, %c0_i32, %c0_i32_0 : i32, i32, i32
  }
  func.func @transform_3(%arg0: i32, %arg1: i32) -> (i32, i32, i32) {
    %c0_i32 = arith.constant 0 : i32
    %c0_i32_0 = arith.constant 0 : i32
    %c0_i32_1 = arith.constant 0 : i32
    return %arg1, %c0_i32, %c0_i32_0 : i32, i32, i32
  }
  func.func @transform_4(%arg0: i32, %arg1: i32) -> (i32, i32, i32) {
    %c0_i32 = arith.constant 0 : i32
    %c0_i32_0 = arith.constant 0 : i32
    %c0_i32_1 = arith.constant 0 : i32
    return %arg1, %c0_i32, %c0_i32_0 : i32, i32, i32
  }
  func.func @transform_5(%arg0: i32, %arg1: i32) -> (i32, i32, i32) {
    %c0_i32 = arith.constant 0 : i32
    %c0_i32_0 = arith.constant 0 : i32
    %c0_i32_1 = arith.constant 0 : i32
    return %arg1, %c0_i32, %c0_i32_0 : i32, i32, i32
  }
  func.func @transform_6(%arg0: i32, %arg1: i32) -> (i32, i32, i32) {
    %c0_i32 = arith.constant 0 : i32
    %c0_i32_0 = arith.constant 0 : i32
    %c0_i32_1 = arith.constant 0 : i32
    return %arg1, %c0_i32, %c0_i32_0 : i32, i32, i32
  }
  func.func @transform_7(%arg0: i32, %arg1: i32) -> (i32, i32, i32) {
    %c0_i32 = arith.constant 0 : i32
    %c0_i32_0 = arith.constant 0 : i32
    %c0_i32_1 = arith.constant 0 : i32
    return %arg1, %c0_i32, %c0_i32_0 : i32, i32, i32
  }
  func.func @transform_8(%arg0: i32, %arg1: i32) -> (i32, i32, i32) {
    %c0_i32 = arith.constant 0 : i32
    %c0_i32_0 = arith.constant 0 : i32
    %c0_i32_1 = arith.constant 0 : i32
    return %arg1, %c0_i32, %c0_i32_0 : i32, i32, i32
  }
  func.func @transform_9(%arg0: i32, %arg1: i32) -> (i32, i32, i32) {
    %c0_i32 = arith.constant 0 : i32
    %c0_i32_0 = arith.constant 0 : i32
    %c0_i32_1 = arith.constant 0 : i32
    return %arg1, %c0_i32, %c0_i32_0 : i32, i32, i32
  }
  func.func @transform_10(%arg0: i32, %arg1: i32) -> (i32, i32, i32) {
    %c0_i32 = arith.constant 0 : i32
    %c0_i32_0 = arith.constant 0 : i32
    %c0_i32_1 = arith.constant 0 : i32
    return %arg1, %c0_i32, %c0_i32_0 : i32, i32, i32
  }
  func.func @transform_11(%arg0: i32, %arg1: i32) -> (i32, i32, i32) {
    %c0_i32 = arith.constant 0 : i32
    %c0_i32_0 = arith.constant 0 : i32
    %c0_i32_1 = arith.constant 0 : i32
    return %arg1, %c0_i32, %c0_i32_0 : i32, i32, i32
  }
  func.func @transform_12(%arg0: i32, %arg1: i32) -> (i32, i32, i32) {
    %c0_i32 = arith.constant 0 : i32
    %c0_i32_0 = arith.constant 0 : i32
    %c0_i32_1 = arith.constant 0 : i32
    return %arg1, %c0_i32, %c0_i32_0 : i32, i32, i32
  }
  func.func @transform_13(%arg0: i32, %arg1: i32) -> (i32, i32) {
    %c0_i32 = arith.constant 0 : i32
    %c0_i32_0 = arith.constant 0 : i32
    return %arg0, %c0_i32 : i32, i32
  }
}

</mosaic_0001>

<bundles_post_ra>
// kernel: tpu_custom_call.1
= control target key start
LH: loop header
LB: loop body
LE: loop exit
PB: predicated region body
PF: predicated region fallthrough
CT: control target
= control target key end

     0   :  { %s3577_s0 = inlined_call_operand.vmem [shape: f32[32,32], index: 0, kind: input, shape index: {}]   ;;  %s3578_s1 = inlined_call_operand.vmem [shape: f32[2,1,32], index: 1, kind: input, shape index: {}]   ;;  %s3579_s2 = inlined_call_operand.vmem [shape: f32[2,1,32], index: 2, kind: input, shape index: {}]   ;;  %s3580_s3 = inlined_call_operand.vmem [shape: bf16[2,32,96], index: 3, kind: input, shape index: {}]   ;;  %s3581_s4 = inlined_call_operand.vmem [shape: f32[2,1,96], index: 4, kind: input, shape index: {}]   ;;  %s3582_s5 = inlined_call_operand.vmem [shape: bf16[2,32,32], index: 5, kind: input, shape index: {}]   ;;  %s3583_s6 = inlined_call_operand.vmem [shape: f32[2,1,32], index: 6, kind: input, shape index: {}]   ;;  %s3584_s7 = inlined_call_operand.vmem [shape: f32[2,1,32], index: 7, kind: input, shape index: {}]   ;;  %s3585_s8 = inlined_call_operand.vmem [shape: f32[2,1,32], index: 8, kind: input, shape index: {}]   ;;  %s3586_s9 = inlined_call_operand.vmem [shape: bf16[2,32,128], index: 9, kind: input, shape index: {}]   ;;  %s3587_s10 = inlined_call_operand.vmem [shape: f32[2,1,128], index: 10, kind: input, shape index: {}]   ;;  %s3588_s11 = inlined_call_operand.vmem [shape: bf16[2,128,32], index: 11, kind: input, shape index: {}]   ;;  %s3589_s12 = inlined_call_operand.vmem [shape: f32[2,1,32], index: 12, kind: input, shape index: {}]   ;;  %s3590_s13 = inlined_call_operand.hbm [shape: f32[32,32], index: 13, kind: output, shape index: {}]  }
   0x1   :  { %3595 = sst [smem:[#allocation11_spill]] %s3580_s3 }
   0x2   :  { %3596 = sst [smem:[#allocation12_spill]] %s3582_s5 }
   0x3   :  { %3597 = sst [smem:[#allocation13_spill]] %s3590_s13 }
   0x4   :  { %18 = vsyncpa [#allocation5], 0  ;;  %s3024_s25 = smov 0   ;;  %s3026_s26 = smov 0  }
   0x5   :  { %s3028_s27 = smov 0  }
   0x6 LB: > { %3598 = sst [smem:[#allocation7_spill]] %s2930_s26  ;;  %s33_s29 = sadd.s32 1, %s2930_s26  ;;  %s2934_s27 = sphi %s3028_s27, %s24_s27   ;;  %s2930_s26 = sphi %s3026_s26, %s3615_s26   ;;  %s2926_s25 = sphi %s3024_s25, %s3614_s25  }
   0x7   : > { %3599 = sst [smem:[#allocation8_spill]] %s2934_s27  ;;  %p34_p0 = scmp.ge.s32.totalorder %s33_s29, 2 }
   0x8   : > { %p2459_p1 = scmp.ge.s32.totalorder %s2934_s27, 1  ;;  %p505_p2 = scmp.lt.s32.totalorder %s2934_s27, 3 }
   0x9   : > { %s3617_s29 = smov (%p34_p0, %s33_s29), 0 }
   0xa   : > { %3600 = sst [smem:[#allocation9_spill]] %s3617_s29  ;;  %p506_p3 = pnand %p2459_p1, %p505_p2 }
   0xc   : > { %509 = sbr.rel (%p506_p3) target bundleno = 2714 (0xa9a), region = 72 }
  0x13   : > { %p594_p4 = scmp.lt.s32.totalorder %s2926_s25, 1  ;;  %s3601_s3 = sld [smem:[#allocation11_spill]] }
  0x14   : > { %s3602_s5 = sld [smem:[#allocation12_spill]]  ;;  %p2468_p5 = scmp.ne.s32.totalorder %s2926_s25, 0 }
  0x15   : > { %s3047_s30 = scalar_select %p594_p4, %s2926_s25, 1 }
  0x16   : > { %643 = sbr.rel (%p2468_p5) target bundleno = 29 (0x1d), region = 76  ;;  %v644_v0 = vld [vmem:[%s3577_s0] sm:$0xff] (!%p2468_p5)  ;;  %vm648_vm0 = vcmask (!%p2468_p5), 261120   ;;  %v645_v1 = vld [vmem:[%s3577_s0 + $0x8] sm:$0xff] (!%p2468_p5)  ;;  %v646_v2 = vld [vmem:[%s3577_s0 + $0x10] sm:$0xff] (!%p2468_p5) }
  0x17   : > { %s2522_s20 = sshll.u32 %s3047_s30, 4  ;;  %s618_s27 = scalar_lea.vmem %s3584_s7, %s3047_s30  ;;  %649 = vst.msk [vmem:[#allocation2] sm:$0xff] (!%p2468_p5), %vm648_vm0, %v644_v0  ;;  %650 = vst.msk [vmem:[#allocation2 + $0x8] sm:$0xff] (!%p2468_p5), %vm648_vm0, %v645_v1  ;;  %v647_v3 = vld [vmem:[%s3577_s0 + $0x18] sm:$0xff] (!%p2468_p5) }
  0x18   : > { %s621_s23 = scalar_lea.vmem %s3585_s8, %s3047_s30  ;;  %s637_s21 = scalar_lea.vmem %s3589_s12, %s3047_s30  ;;  %651 = vst.msk [vmem:[#allocation2 + $0x10] sm:$0xff] (!%p2468_p5), %vm648_vm0, %v646_v2  ;;  %652 = vst.msk [vmem:[#allocation2 + $0x18] sm:$0xff] (!%p2468_p5), %vm648_vm0, %v647_v3 }
  0x19   : > { %s3065_s15 = scalar_lea.vmem %s3601_s3, %s2522_s20  ;;  %s3087_s3 = scalar_lea.vmem %s3586_s9, %s2522_s20 }
  0x1a   : > { %s3070_s26 = scalar_lea.vmem %s3602_s5, %s2522_s20  ;;  %s629_s5 = scalar_lea.vmem %s3587_s10, %s3047_s30 }
  0x1b   : > { %3603 = sst [smem:[#allocation10_spill]] %s3070_s26  ;;  %s2525_s26 = sshll.u32 %s3047_s30, 6 }
  0x1c   : > { %s3097_s17 = scalar_lea.vmem %s3588_s11, %s2525_s26 }
  0x1d PF: > { %vm659_vm1 = vcmask 261120   ;;  %v2768_v32 = vld [vmem:[%s3065_s15] sm:$0xff]   ;;  %v2769_v33 = vld [vmem:[%s3065_s15 + $0x8] sm:$0xff]   ;;  %s3604_s19 = scalar_lea.vmem %s3578_s1, %s3047_s30  ;;  %s3605_s20 = scalar_lea.vmem %s3579_s2, %s3047_s30  ;;  %v2936_v2 = vmov 0.0   ;;  %vm2937_vm2 = vmmov 0   ;;  %vm821_vm3 = vcmask 64512  }
  0x1e   : > { %v653_v4 = vld [vmem:[#allocation2] sm:$0xff]  ;;  %v654_v6 = vld [vmem:[#allocation2 + $0x8] sm:$0xff]  ;;  %2580 = vmatprep.subr.bf16.mxu0 %v2768_v32  ;;  %2600 = vmatprep.subr.bf16.mxu1 %v2936_v2  ;;  %s3606_s28 = scalar_lea.vmem %s3581_s4, %s3047_s30  ;;  %s2938_s29 = smov 88   ;;  %vm869_vm5 = vcmask 130048   ;;  %vm1071_vm6 = vcmask 130112   ;;  %vm1203_vm7 = vcmask 195712  }
  0x1f   : > { %v655_v5 = vld [vmem:[#allocation2 + $0x10] sm:$0xff]  ;;  %v660_v7 = vsel %vm659_vm1, %v653_v4, 0.0  ;;  %v656_v9 = vld [vmem:[#allocation2 + $0x18] sm:$0xff]  ;;  %v663_v10 = vsel %vm659_vm1, %v654_v6, 0.0  ;;  %2581 = vmatpush3.bf16.msra.mxu0 %v2768_v32  ;;  %v2469_v48 = vld [vmem:[%s3604_s19] ss:$0 sm:$0xff]  ;;  %2602 = vmatprep.mubr.msk.bf16.mxu1 %vm2937_vm2, %v2936_v2 }
  0x20   : > { %v666_v8 = vsel %vm659_vm1, %v655_v5, 0.0  ;;  %661 = vadd.xlane.f32.xlu0 %v660_v7  ;;  %v669_v11 = vsel %vm659_vm1, %v656_v9, 0.0  ;;  %2582 = vmatprep.subr.bf16.mxu0 %v2769_v33  ;;  %v2470_v54 = vld [vmem:[%s3605_s20] ss:$0 sm:$0xff]  ;;  %s2939_s26 = smov 96   ;;  %s2940_s13 = smov 120  }
  0x21   : > { %667 = vadd.xlane.f32.xlu1 %v666_v8  ;;  %s2941_s15 = smov 112   ;;  %s2942_s16 = smov 80   ;;  %vm1335_vm8 = vcmask 261312  }
  0x22   : > { %s2943_s19 = smov 104   ;;  %s2944_s18 = smov 72  }
  0x23   : > { %2583 = vmatpush3.bf16.msra.mxu0 %v2769_v33  ;;  %s2945_s22 = smov 64   ;;  %s2946_s20 = smov 56  }
  0x24   : > { %664 = vadd.xlane.f32.xlu0 %v663_v10  ;;  %2588 = vmatprep.subr.bf16.mxu0 %v2936_v2  ;;  %s2947_s24 = smov 48   ;;  %s2948_s14 = smov 40  }
  0x25   : > { %670 = vadd.xlane.f32.xlu1 %v669_v11  ;;  %p2517_p6 = scmp.ne.s32.totalorder %s2926_s25, 1 }
  0xad   : > { %v662_v12 = vpop.xlane.xlu0 %661 }
  0xae   : > { %v668_v13 = vpop.xlane.xlu1 %667  ;;  %v673_v14 = vmul.f32 0.03125, %v662_v12 }
  0xaf   : > { %v675_v15 = vmul.f32 0.03125, %v668_v13 }
  0xb0   : > { %v677_v16 = vsub.f32 %v653_v4, %v673_v14  ;;  %v2471_v4 = vld [vmem:[%s3606_s28] ss:$0 sm:$0xff]  ;;  %s2949_s28 = smov 8  }
  0xb1   : > { %v679_v17 = vsub.f32 %v655_v5, %v675_v15  ;;  %v665_v18 = vpop.xlane.xlu0 %664 }
  0xb2   : > { %v671_v19 = vpop.xlane.xlu1 %670  ;;  %v674_v20 = vmul.f32 0.03125, %v665_v18  ;;  %v681_v22 = vmul.f32 %v677_v16, %v677_v16 }
  0xb3   : > { %v676_v21 = vmul.f32 0.03125, %v671_v19  ;;  %v683_v23 = vmul.f32 %v679_v17, %v679_v17 }
  0xb4   : > { %v678_v24 = vsub.f32 %v654_v6, %v674_v20  ;;  %v685_v26 = vsel %vm659_vm1, %v681_v22, 0.0 }
  0xb5   : > { %v680_v25 = vsub.f32 %v656_v9, %v676_v21  ;;  %686 = vadd.xlane.f32.xlu0 %v685_v26  ;;  %v691_v27 = vsel %vm659_vm1, %v683_v23, 0.0 }
  0xb6   : > { %v682_v28 = vmul.f32 %v678_v24, %v678_v24 }
  0xb7   : > { %v684_v29 = vmul.f32 %v680_v25, %v680_v25 }
  0xb8   : > { %v688_v30 = vsel %vm659_vm1, %v682_v28, 0.0 }
  0xb9   : > { %692 = vadd.xlane.f32.xlu0 %v691_v27  ;;  %689 = vadd.xlane.f32.xlu1 %v688_v30  ;;  %v694_v31 = vsel %vm659_vm1, %v684_v29, 0.0 }
  0xbd   : > { %695 = vadd.xlane.f32.xlu1 %v694_v31 }
 0x142   : > { %v687_v34 = vpop.xlane.xlu0 %686 }
 0x143   : > { %v697_v35 = vmul.f32 0.03125, %v687_v34 }
 0x145   : > { %v701_v36 = vadd.f32 1e-05, %v697_v35 }
 0x146   : > { %v690_v37 = vpop.xlane.xlu1 %689  ;;  %v693_v38 = vpop.xlane.xlu0 %692 }
 0x147   : > { %2782 = vrsqrt.f32 %v701_v36  ;;  %v698_v39 = vmul.f32 0.03125, %v690_v37  ;;  %v699_v40 = vmul.f32 0.03125, %v693_v38  ;;  %v813_v37 = vlaneseq }
 0x149   : > { %v702_v41 = vadd.f32 1e-05, %v698_v39  ;;  %v703_v42 = vadd.f32 1e-05, %v699_v40  ;;  %v814_v38 = vand.u32 127, %v813_v37 }
 0x14a   : > { %v696_v43 = vpop.xlane.xlu1 %695 }
 0x14b   : > { %2784 = vrsqrt.f32 %v702_v41  ;;  %v700_v44 = vmul.f32 0.03125, %v696_v43  ;;  %vm815_vm4 = vcmp.ge.s32.totalorder %v814_v38, 8 }
 0x14c   : > { %2786 = vrsqrt.f32 %v703_v42  ;;  %v3210_v39 = vsel %vm815_vm4, -1e+09, %v2936_v2 }
 0x14d   : > { %v704_v45 = vadd.f32 1e-05, %v700_v44 }
 0x14f   : > { %2788 = vrsqrt.f32 %v704_v45 }
 0x151   : > { %v2783_v46 = vpop.eup %2782 }
 0x152   : > { %v709_v47 = vmul.f32 %v2783_v46, %v677_v16 }
 0x154   : > { %v719_v52 = vmul.f32 %v2469_v48, %v709_v47 }
 0x155   : > { %v2785_v49 = vpop.eup %2784 }
 0x156   : > { %v2787_v50 = vpop.eup %2786  ;;  %v710_v51 = vmul.f32 %v2785_v49, %v678_v24  ;;  %v729_v58 = vadd.f32 %v2470_v54, %v719_v52 }
 0x157   : > { %v711_v53 = vmul.f32 %v2787_v50, %v679_v17 }
 0x158   : > { %v720_v55 = vmul.f32 %v2469_v48, %v710_v51 }
 0x159   : > { %v2789_v56 = vpop.eup %2788  ;;  %v721_v60 = vmul.f32 %v2469_v48, %v711_v53 }
 0x15a   : > { %v712_v57 = vmul.f32 %v2789_v56, %v680_v25  ;;  %v730_v59 = vadd.f32 %v2470_v54, %v720_v55 }
 0x15b   : > { %v731_v63 = vadd.f32 %v2470_v54, %v721_v60 }
 0x15c   : > { %v733_v61 = vpack.c.bf16 %v730_v59, %v729_v58  ;;  %v722_v62 = vmul.f32 %v2469_v48, %v712_v57 }
 0x15e   : > { %2584 = vmatprep.mubr.msk.bf16.mxu0 %vm659_vm1, %v733_v61  ;;  %v732_v0 = vadd.f32 %v2470_v54, %v722_v62 }
 0x160   : > { %v734_v1 = vpack.c.bf16 %v732_v0, %v731_v63 }
 0x162   : > { %2585 = vmatmul.mubr.msk.bf16.vlgmr.msra.gmra.mrb[0].mxu0 %vm659_vm1, %v734_v1 }
 0x163   : > { %2590 = vmatprep.mubr.msk.bf16.mxu0 %vm2937_vm2, %v2936_v2 }
 0x235   : > { %v2586_v3 = vpop.f32.mrb[0].mxu0 }
 0x236   : > { %v798_v5 = vpop.f32.mrb[1].mxu0  ;;  %v807_v7 = vadd.f32 %v2586_v3, %v2471_v4 }
 0x237   : > { %v2587_v6 = vpop.f32.mrb[2].mxu0  ;;  %v799_v10 = vadd.f32 %v2471_v4, %v798_v5 }
 0x238   : > { %v810_v8 = vadd.f32 %v2587_v6, %v2471_v4  ;;  %v801_v9 = vpop.f32.mrb[3].mxu0 }
 0x239   : > { %v802_v11 = vadd.f32 %v2471_v4, %v801_v9 }
 0x23a   : > { %v3149_v12 = vpack.c.bf16 %v810_v8, %v807_v7 }
 0x23b   : > { %v3151_v13 = vpack.c.bf16 %v802_v11, %v799_v10 }
 0x23d   : > { %944 = vrot.lane.b32.xlu1 %v3151_v13, %s2938_s29  ;;  %819 = vrot.lane.b32.xlu0 %v3151_v13, %s2939_s26 }
 0x241   : > { %942 = vrot.lane.b32.xlu1 %v3151_v13, %s2940_s13  ;;  %1074 = vrot.lane.b32.xlu0 %v3151_v13, %s2941_s15 }
 0x245   : > { %1076 = vrot.lane.b32.xlu1 %v3151_v13, %s2942_s16  ;;  %1206 = vrot.lane.b32.xlu0 %v3151_v13, %s2943_s19 }
 0x249   : > { %1208 = vrot.lane.b32.xlu1 %v3151_v13, %s2944_s18  ;;  %1463 = vrot.lane.b32.xlu0 %v3149_v12, %s2938_s29  ;;  %s2950_s29 = smov 16  }
 0x24d   : > { %1340 = vrot.lane.b32.xlu1 %v3149_v12, %s2939_s26  ;;  %1594 = vrot.lane.b32.xlu0 %v3149_v12, %s2942_s16  ;;  %s2951_s26 = smov 24  }
 0x251   : > { %1461 = vrot.lane.b32.xlu1 %v3149_v12, %s2940_s13  ;;  %1725 = vrot.lane.b32.xlu0 %v3149_v12, %s2944_s18  ;;  %s3607_s13 = sld [smem:[#allocation10_spill]] }
 0x255   : > { %1592 = vrot.lane.b32.xlu1 %v3149_v12, %s2941_s15  ;;  %893 = vrot.lane.b32.xlu0 %v3151_v13, %s2945_s22 }
 0x259   : > { %1723 = vrot.lane.b32.xlu1 %v3149_v12, %s2943_s19  ;;  %s3608_s19 = scalar_lea.vmem %s3583_s6, %s3047_s30 }
 0x2af   : > { %v945_v14 = vpop.permute.xlu1 %944  ;;  %v820_v15 = vpop.permute.xlu0 %819 }
 0x2b0   : > { %v826_v16 = vsel %vm821_vm3, %v820_v15, 0  ;;  %v950_v17 = vsel %vm821_vm3, %v945_v14, 0 }
 0x2b1   : > { %2589 = vmatpush3.bf16.xpose.msra.mxu0 %v826_v16  ;;  %2601 = vmatpush3.bf16.xpose.msra.mxu1 %v950_v17 }
 0x2b2   : > { %2612 = vmatprep.subr.bf16.mxu1 %v2936_v2  ;;  %2594 = vmatprep.subr.bf16.mxu0 %v2936_v2 }
 0x2b3   : > { %v943_v18 = vpop.permute.xlu1 %942  ;;  %v1075_v19 = vpop.permute.xlu0 %1074 }
 0x2b7   : > { %v1077_v20 = vpop.permute.xlu1 %1076  ;;  %v1207_v21 = vpop.permute.xlu0 %1206 }
 0x2b8   : > { %v1082_v22 = vsel %vm821_vm3, %v1077_v20, 0  ;;  %2591 = vmatmul.mubr.msk.bf16.vlgmr.msra.gmra.mrb[4].mxu0 %vm821_vm3, %v3151_v13  ;;  %2603 = vmatmul.mubr.msk.bf16.vlgmr.msra.gmra.mrb[0].mxu1 %vm821_vm3, %v943_v18 }
 0x2b9   : > { %2613 = vmatpush3.bf16.xpose.msra.mxu1 %v1082_v22  ;;  %2614 = vmatprep.mubr.msk.bf16.mxu1 %vm2937_vm2, %v2936_v2 }
 0x2ba   : > { %2624 = vmatprep.subr.bf16.mxu1 %v2936_v2  ;;  %2596 = vmatprep.mubr.msk.bf16.mxu0 %vm2937_vm2, %v2936_v2 }
 0x2bb   : > { %v1464_v23 = vpop.permute.xlu0 %1463  ;;  %v1209_v24 = vpop.permute.xlu1 %1208 }
 0x2bc   : > { %v1214_v26 = vsel %vm821_vm3, %v1209_v24, 0  ;;  %v1469_v31 = vsel %vm821_vm3, %v1464_v23, 0 }
 0x2bf   : > { %v1595_v25 = vpop.permute.xlu0 %1594  ;;  %v1341_v28 = vpop.permute.xlu1 %1340 }
 0x2c0   : > { %2615 = vmatmul.mubr.msk.bf16.vlgmr.msra.gmra.mrb[4].mxu1 %vm821_vm3, %v1075_v19  ;;  %v1346_v30 = vsel %vm821_vm3, %v1341_v28, 0  ;;  %v1600_v33 = vsel %vm821_vm3, %v1595_v25, 0 }
 0x2c1   : > { %2625 = vmatpush3.bf16.xpose.msra.mxu1 %v1214_v26  ;;  %2626 = vmatprep.mubr.msk.bf16.mxu1 %vm2937_vm2, %v2936_v2 }
 0x2c2   : > { %2636 = vmatprep.subr.bf16.mxu1 %v2936_v2 }
 0x2c3   : > { %v1726_v27 = vpop.permute.xlu0 %1725  ;;  %v1462_v32 = vpop.permute.xlu1 %1461 }
 0x2c4   : > { %v1731_v35 = vsel %vm821_vm3, %v1726_v27, 0 }
 0x2c7   : > { %v894_v29 = vpop.permute.xlu0 %893  ;;  %v1593_v34 = vpop.permute.xlu1 %1592 }
 0x2c8   : > { %2595 = vmatpush3.bf16.msra.mxu0 %v894_v29  ;;  %2627 = vmatmul.mubr.msk.bf16.vlgmr.msra.gmra.mrb[8].mxu1 %vm821_vm3, %v1207_v21 }
 0x2c9   : > { %2637 = vmatpush3.bf16.xpose.msra.mxu1 %v1346_v30  ;;  %2638 = vmatprep.mubr.msk.bf16.mxu1 %vm2937_vm2, %v2936_v2 }
 0x2ca   : > { %2648 = vmatprep.subr.bf16.mxu1 %v2936_v2  ;;  %2606 = vmatprep.subr.bf16.mxu0 %v2936_v2 }
 0x2cb   : > { %v1724_v36 = vpop.permute.xlu1 %1723 }
 0x2d0   : > { %2639 = vmatmul.mubr.msk.bf16.vlgmr.msra.gmra.mrb[12].mxu1 %vm821_vm3, %v3149_v12 }
 0x2d1   : > { %2649 = vmatpush3.bf16.xpose.msra.mxu1 %v1469_v31  ;;  %2650 = vmatprep.mubr.msk.bf16.mxu1 %vm2937_vm2, %v2936_v2 }
 0x2d2   : > { %2660 = vmatprep.subr.bf16.mxu1 %v2936_v2 }
 0x2d8   : > { %2651 = vmatmul.mubr.msk.bf16.vlgmr.msra.gmra.mrb[16].mxu1 %vm821_vm3, %v1462_v32 }
 0x2d9   : > { %2661 = vmatpush3.bf16.xpose.msra.mxu1 %v1600_v33  ;;  %2662 = vmatprep.mubr.msk.bf16.mxu1 %vm2937_vm2, %v2936_v2 }
 0x2da   : > { %2672 = vmatprep.subr.bf16.mxu1 %v2936_v2 }
 0x2e0   : > { %2663 = vmatmul.mubr.msk.bf16.vlgmr.msra.gmra.mrb[20].mxu1 %vm821_vm3, %v1593_v34 }
 0x2e1   : > { %2673 = vmatpush3.bf16.xpose.msra.mxu1 %v1731_v35  ;;  %2674 = vmatprep.mubr.msk.bf16.mxu1 %vm2937_vm2, %v2936_v2 }
 0x2e8   : > { %2675 = vmatmul.mubr.msk.bf16.vlgmr.msra.gmra.mrb[24].mxu1 %vm821_vm3, %v1724_v36 }
 0x38b   : > { %v862_v40 = vpop.f32.mrb[4].mxu0  ;;  %v986_v41 = vpop.f32.mrb[0].mxu1 }
 0x38c   : > { %v3213_v42 = vadd.f32 %v862_v40, %v3210_v39  ;;  %v2592_v43 = vpop.f32.mrb[5].mxu0  ;;  %v2604_v44 = vpop.f32.mrb[1].mxu1  ;;  %v3216_v47 = vadd.f32 %v986_v41, %v3210_v39 }
 0x38d   : > { %v865_v45 = vpop.f32.mrb[6].mxu0  ;;  %v989_v46 = vpop.f32.mrb[2].mxu1 }
 0x38e   : > { %v3219_v48 = vadd.f32 %v865_v45, %v3210_v39  ;;  %v2593_v49 = vpop.f32.mrb[7].mxu0  ;;  %v2605_v50 = vpop.f32.mrb[3].mxu1  ;;  %v870_v51 = vsel %vm869_vm5, %v3213_v42, -inf  ;;  %v3226_v53 = vadd.f32 %v989_v46, %v3210_v39  ;;  %v993_v54 = vsel %vm869_vm5, %v3216_v47, -inf }
 0x38f   : > { %871 = vmax.xlane.f32.xlu0 %v870_v51 }
 0x390   : > { %v873_v52 = vsel %vm869_vm5, %v3219_v48, -inf  ;;  %v996_v60 = vsel %vm869_vm5, %v3226_v53, -inf }
 0x391   : > { %874 = vmax.xlane.f32.xlu1 %v873_v52 }
 0x393   : > { %994 = vmax.xlane.f32.xlu0 %v993_v54  ;;  %v1118_v55 = vpop.f32.mrb[4].mxu1 }
 0x394   : > { %v2616_v56 = vpop.f32.mrb[5].mxu1  ;;  %v3231_v58 = vadd.f32 %v1118_v55, %v3210_v39 }
 0x395   : > { %v1121_v57 = vpop.f32.mrb[6].mxu1 }
 0x396   : > { %v2617_v59 = vpop.f32.mrb[7].mxu1  ;;  %v1125_v61 = vsel %vm869_vm5, %v3231_v58, -inf  ;;  %v3274_v34 = vadd.f32 %v1121_v57, %v3210_v39 }
 0x397   : > { %997 = vmax.xlane.f32.xlu0 %v996_v60 }
 0x398   : > { %v1128_v36 = vsel %vm869_vm5, %v3274_v34, -inf }
 0x39b   : > { %1126 = vmax.xlane.f32.xlu0 %v1125_v61  ;;  %v1250_v62 = vpop.f32.mrb[8].mxu1 }
 0x39c   : > { %v3238_v63 = vadd.f32 %v1250_v62, %v3210_v39  ;;  %v2628_v0 = vpop.f32.mrb[9].mxu1 }
 0x39d   : > { %v1253_v1 = vpop.f32.mrb[10].mxu1 }
 0x39e   : > { %v2629_v3 = vpop.f32.mrb[11].mxu1  ;;  %v1257_v4 = vsel %vm869_vm5, %v3238_v63, -inf  ;;  %v3277_v35 = vadd.f32 %v1253_v1, %v3210_v39 }
 0x39f   : > { %1258 = vmax.xlane.f32.xlu0 %v1257_v4 }
 0x3a0   : > { %v1260_v38 = vsel %vm869_vm5, %v3277_v35, -inf }
 0x3a2   : > { %1016 = vrot.lane.b32.xlu1 %v3151_v13, %s2946_s20 }
 0x3a3   : > { %v1382_v5 = vpop.f32.mrb[12].mxu1 }
 0x3a4   : > { %v3245_v6 = vadd.f32 %v1382_v5, %v3210_v39  ;;  %v2640_v7 = vpop.f32.mrb[13].mxu1 }
 0x3a5   : > { %v1385_v8 = vpop.f32.mrb[14].mxu1 }
 0x3a6   : > { %v2641_v9 = vpop.f32.mrb[15].mxu1  ;;  %v1389_v10 = vsel %vm869_vm5, %v3245_v6, -inf  ;;  %v3282_v37 = vadd.f32 %v1385_v8, %v3210_v39 }
 0x3a7   : > { %1390 = vmax.xlane.f32.xlu0 %v1389_v10 }
 0x3a8   : > { %v1392_v40 = vsel %vm869_vm5, %v3282_v37, -inf }
 0x3ab   : > { %v1505_v11 = vpop.f32.mrb[16].mxu1 }
 0x3ac   : > { %v3250_v14 = vadd.f32 %v1505_v11, %v3210_v39  ;;  %v2652_v15 = vpop.f32.mrb[17].mxu1 }
 0x3ad   : > { %v1508_v16 = vpop.f32.mrb[18].mxu1 }
 0x3ae   : > { %v3253_v17 = vadd.f32 %v1508_v16, %v3210_v39  ;;  %v2653_v18 = vpop.f32.mrb[19].mxu1  ;;  %v1512_v19 = vsel %vm869_vm5, %v3250_v14, -inf }
 0x3af   : > { %1513 = vmax.xlane.f32.xlu0 %v1512_v19 }
 0x3b0   : > { %v1515_v41 = vsel %vm869_vm5, %v3253_v17, -inf }
 0x3b3   : > { %v1636_v20 = vpop.f32.mrb[20].mxu1 }
 0x3b4   : > { %v3258_v21 = vadd.f32 %v1636_v20, %v3210_v39  ;;  %v2664_v22 = vpop.f32.mrb[21].mxu1 }
 0x3b5   : > { %v1639_v23 = vpop.f32.mrb[22].mxu1 }
 0x3b6   : > { %v3261_v24 = vadd.f32 %v1639_v23, %v3210_v39  ;;  %v2665_v25 = vpop.f32.mrb[23].mxu1  ;;  %v1643_v26 = vsel %vm869_vm5, %v3258_v21, -inf }
 0x3b7   : > { %1644 = vmax.xlane.f32.xlu0 %v1643_v26 }
 0x3bb   : > { %v1767_v27 = vpop.f32.mrb[24].mxu1 }
 0x3bc   : > { %v3266_v28 = vadd.f32 %v1767_v27, %v3210_v39  ;;  %v2676_v29 = vpop.f32.mrb[25].mxu1 }
 0x3bd   : > { %v1770_v30 = vpop.f32.mrb[26].mxu1 }
 0x3be   : > { %v3269_v31 = vadd.f32 %v1770_v30, %v3210_v39  ;;  %v2677_v32 = vpop.f32.mrb[27].mxu1  ;;  %v1774_v33 = vsel %vm869_vm5, %v3266_v28, -inf  ;;  %v1646_v39 = vsel %vm869_vm5, %v3261_v24, -inf }
 0x3bf   : > { %1775 = vmax.xlane.f32.xlu0 %v1774_v33 }
 0x3c0   : > { %v1777_v43 = vsel %vm869_vm5, %v3269_v31, -inf }
 0x3c6   : > { %1129 = vmax.xlane.f32.xlu1 %v1128_v36 }
 0x3ca   : > { %1261 = vmax.xlane.f32.xlu1 %v1260_v38 }
 0x3ce   : > { %1393 = vmax.xlane.f32.xlu1 %v1392_v40 }
 0x3d2   : > { %1516 = vmax.xlane.f32.xlu1 %v1515_v41 }
 0x3d5   : > { %1148 = vrot.lane.b32.xlu0 %v3151_v13, %s2947_s24 }
 0x3d6   : > { %1647 = vmax.xlane.f32.xlu1 %v1646_v39 }
 0x3da   : > { %1778 = vmax.xlane.f32.xlu1 %v1777_v43 }
 0x3eb   : > { %1280 = vrot.lane.b32.xlu1 %v3151_v13, %s2948_s14 }
 0x41c   : > { %v872_v44 = vpop.xlane.xlu0 %871 }
 0x41d   : > { %v876_v45 = vsub.f32 %v3213_v42, %v872_v44 }
 0x41e   : > { %v875_v46 = vpop.xlane.xlu1 %874 }
 0x41f   : > { %v878_v49 = vmul.f32 1.442695, %v876_v45  ;;  %v877_v50 = vsub.f32 %v3219_v48, %v875_v46 }
 0x420   : > { %v995_v51 = vpop.xlane.xlu0 %994 }
 0x421   : > { %2790 = vpow2.f32 %v878_v49  ;;  %v880_v52 = vmul.f32 1.442695, %v877_v50  ;;  %v999_v54 = vsub.f32 %v3216_v47, %v995_v51 }
 0x422   : > { %v3328_v10 = vpop.permute.xlu1 %1016 }
 0x423   : > { %2792 = vpow2.f32 %v880_v52  ;;  %v1001_v55 = vmul.f32 1.442695, %v999_v54 }
 0x424   : > { %v998_v56 = vpop.xlane.xlu0 %997 }
 0x425   : > { %2794 = vpow2.f32 %v1001_v55  ;;  %v1000_v57 = vsub.f32 %v3226_v53, %v998_v56 }
 0x427   : > { %v1003_v59 = vmul.f32 1.442695, %v1000_v57 }
 0x428   : > { %v1127_v13 = vpop.xlane.xlu0 %1126 }
 0x429   : > { %2796 = vpow2.f32 %v1003_v59  ;;  %v1131_v42 = vsub.f32 %v3231_v58, %v1127_v13 }
 0x42b   : > { %v3303_v60 = vpop.eup %2790  ;;  %v1133_v61 = vmul.f32 1.442695, %v1131_v42 }
 0x42c   : > { %v1259_v48 = vpop.xlane.xlu0 %1258  ;;  %v882_v62 = vsel %vm869_vm5, %v3303_v60, 0.0 }
 0x42d   : > { %v3307_v0 = vpop.eup %2792  ;;  %2798 = vpow2.f32 %v1133_v61  ;;  %v1263_v47 = vsub.f32 %v3238_v63, %v1259_v48  ;;  %883 = vadd.xlane.f32.xlu0 %v882_v62 }
 0x42e   : > { %v885_v53 = vsel %vm869_vm5, %v3307_v0, 0.0 }
 0x42f   : > { %v3312_v1 = vpop.eup %2794  ;;  %v1265_v3 = vmul.f32 1.442695, %v1263_v47  ;;  %886 = vadd.xlane.f32.xlu1 %v885_v53 }
 0x430   : > { %v1005_v58 = vsel %vm869_vm5, %v3312_v1, 0.0 }
 0x431   : > { %2800 = vpow2.f32 %v1265_v3  ;;  %1006 = vadd.xlane.f32.xlu0 %v1005_v58 }
 0x433   : > { %v3316_v4 = vpop.eup %2796 }
 0x434   : > { %v1008_v5 = vsel %vm869_vm5, %v3316_v4, 0.0  ;;  %v1391_v11 = vpop.xlane.xlu0 %1390 }
 0x435   : > { %1009 = vadd.xlane.f32.xlu1 %v1008_v5  ;;  %v1395_v19 = vsub.f32 %v3245_v6, %v1391_v11 }
 0x437   : > { %v3320_v63 = vpop.eup %2798  ;;  %v1397_v26 = vmul.f32 1.442695, %v1395_v19 }
 0x438   : > { %v1137_v7 = vsel %vm869_vm5, %v3320_v63, 0.0 }
 0x439   : > { %1138 = vadd.xlane.f32.xlu0 %v1137_v7 }
 0x43b   : > { %v3324_v8 = vpop.eup %2800 }
 0x43c   : > { %v1269_v9 = vsel %vm869_vm5, %v3324_v8, 0.0  ;;  %v1514_v18 = vpop.xlane.xlu0 %1513 }
 0x43d   : > { %1270 = vadd.xlane.f32.xlu0 %v1269_v9  ;;  %v1518_v30 = vsub.f32 %v3250_v14, %v1514_v18 }
 0x43f   : > { %v1520_v38 = vmul.f32 1.442695, %v1518_v30 }
 0x444   : > { %v1645_v25 = vpop.xlane.xlu0 %1644 }
 0x44c   : > { %v1776_v33 = vpop.xlane.xlu0 %1775 }
 0x44d   : > { %v1780_v6 = vsub.f32 %v3266_v28, %v1776_v33 }
 0x450   : > { %v1149_v3 = vpop.permute.xlu0 %1148 }
 0x453   : > { %v1130_v15 = vpop.xlane.xlu1 %1129  ;;  %1412 = vrot.lane.b32.xlu0 %v3149_v12, %s2945_s22 }
 0x454   : > { %v1132_v16 = vsub.f32 %v3274_v34, %v1130_v15 }
 0x456   : > { %v1135_v20 = vmul.f32 1.442695, %v1132_v16 }
 0x457   : > { %v1262_v22 = vpop.xlane.xlu1 %1261 }
 0x458   : > { %2802 = vpow2.f32 %v1135_v20  ;;  %v1264_v23 = vsub.f32 %v3277_v35, %v1262_v22  ;;  %v1649_v35 = vsub.f32 %v3258_v21, %v1645_v25 }
 0x45a   : > { %v1267_v27 = vmul.f32 1.442695, %v1264_v23  ;;  %v1651_v45 = vmul.f32 1.442695, %v1649_v35 }
 0x45b   : > { %v1394_v29 = vpop.xlane.xlu1 %1393 }
 0x45c   : > { %2804 = vpow2.f32 %v1267_v27  ;;  %v1396_v32 = vsub.f32 %v3282_v37, %v1394_v29  ;;  %v1782_v37 = vmul.f32 1.442695, %v1780_v6 }
 0x45d   : > { %2806 = vpow2.f32 %v1397_v26 }
 0x45e   : > { %v1399_v34 = vmul.f32 1.442695, %v1396_v32 }
 0x45f   : > { %v1517_v36 = vpop.xlane.xlu1 %1516 }
 0x460   : > { %v1519_v40 = vsub.f32 %v3253_v17, %v1517_v36  ;;  %2808 = vpow2.f32 %v1399_v34 }
 0x461   : > { %2810 = vpow2.f32 %v1520_v38 }
 0x462   : > { %v3339_v41 = vpop.eup %2802  ;;  %v1522_v39 = vmul.f32 1.442695, %v1519_v40 }
 0x463   : > { %v1648_v43 = vpop.xlane.xlu1 %1647  ;;  %v1140_v14 = vsel %vm869_vm5, %v3339_v41, 0.0 }
 0x464   : > { %1141 = vadd.xlane.f32.xlu1 %v1140_v14  ;;  %2812 = vpow2.f32 %v1522_v39  ;;  %v1650_v28 = vsub.f32 %v3261_v24, %v1648_v43 }
 0x465   : > { %2814 = vpow2.f32 %v1782_v37 }
 0x466   : > { %v3344_v44 = vpop.eup %2804  ;;  %2816 = vpow2.f32 %v1651_v45  ;;  %v1653_v49 = vmul.f32 1.442695, %v1650_v28 }
 0x467   : > { %v1779_v17 = vpop.xlane.xlu1 %1778  ;;  %v1272_v46 = vsel %vm869_vm5, %v3344_v44, 0.0  ;;  %v3349_v21 = vpop.eup %2806 }
 0x468   : > { %1273 = vadd.xlane.f32.xlu1 %v1272_v46  ;;  %v1781_v50 = vsub.f32 %v3269_v31, %v1779_v17  ;;  %v1401_v51 = vsel %vm869_vm5, %v3349_v21, 0.0  ;;  %2818 = vpow2.f32 %v1653_v49 }
 0x46a   : > { %v3354_v52 = vpop.eup %2808  ;;  %v1784_v24 = vmul.f32 1.442695, %v1781_v50 }
 0x46b   : > { %v3356_v54 = vpop.eup %2810  ;;  %v1404_v55 = vsel %vm869_vm5, %v3354_v52, 0.0  ;;  %v1281_v58 = vpop.permute.xlu1 %1280 }
 0x46c   : > { %1402 = vadd.xlane.f32.xlu1 %v1401_v51  ;;  %v1524_v57 = vsel %vm869_vm5, %v3356_v54, 0.0  ;;  %2820 = vpow2.f32 %v1784_v24 }
 0x46e   : > { %v3360_v56 = vpop.eup %2812 }
 0x46f   : > { %v3364_v31 = vpop.eup %2814  ;;  %v1527_v59 = vsel %vm869_vm5, %v3360_v56, 0.0 }
 0x470   : > { %1405 = vadd.xlane.f32.xlu1 %v1404_v55  ;;  %v3368_v13 = vpop.eup %2816  ;;  %v1786_v42 = vsel %vm869_vm5, %v3364_v31, 0.0 }
 0x471   : > { %v1655_v61 = vsel %vm869_vm5, %v3368_v13, 0.0 }
 0x472   : > { %1525 = vadd.xlane.f32.xlu0 %v1524_v57  ;;  %v3374_v48 = vpop.eup %2818 }
 0x473   : > { %v1658_v62 = vsel %vm869_vm5, %v3374_v48, 0.0 }
 0x474   : > { %1528 = vadd.xlane.f32.xlu1 %v1527_v59 }
 0x476   : > { %1787 = vadd.xlane.f32.xlu0 %v1786_v42  ;;  %v3378_v47 = vpop.eup %2820 }
 0x477   : > { %v1789_v53 = vsel %vm869_vm5, %v3378_v47, 0.0 }
 0x478   : > { %1656 = vadd.xlane.f32.xlu1 %v1655_v61 }
 0x47c   : > { %1659 = vadd.xlane.f32.xlu1 %v1658_v62 }
 0x480   : > { %1790 = vadd.xlane.f32.xlu1 %v1789_v53 }
 0x48c   : > { %1666 = vrot.lane.b32.xlu0 %v3149_v12, %s2947_s24 }
 0x490   : > { %1797 = vrot.lane.b32.xlu0 %v3149_v12, %s2948_s14 }
 0x491   : > { %1535 = vrot.lane.b32.xlu1 %v3149_v12, %s2946_s20 }
 0x4ba   : > { %v884_v5 = vpop.xlane.xlu0 %883 }
 0x4bb   : > { %2822 = vrcp.f32 %v884_v5 }
 0x4bc   : > { %v887_v7 = vpop.xlane.xlu1 %886 }
 0x4bd   : > { %2824 = vrcp.f32 %v887_v7 }
 0x4be   : > { %v1007_v9 = vpop.xlane.xlu0 %1006 }
 0x4bf   : > { %2826 = vrcp.f32 %v1007_v9 }
 0x4c2   : > { %v1010_v11 = vpop.xlane.xlu1 %1009 }
 0x4c3   : > { %2828 = vrcp.f32 %v1010_v11 }
 0x4c5   : > { %v2823_v15 = vpop.eup %2822 }
 0x4c6   : > { %v890_v18 = vmul.f32 %v2823_v15, %v3303_v60  ;;  %v1139_v60 = vpop.xlane.xlu0 %1138 }
 0x4c7   : > { %v2825_v16 = vpop.eup %2824  ;;  %2830 = vrcp.f32 %v1139_v60 }
 0x4c8   : > { %v891_v19 = vmul.f32 %v2825_v16, %v3307_v0 }
 0x4c9   : > { %v2827_v22 = vpop.eup %2826 }
 0x4ca   : > { %v892_v20 = vpack.c.bf16 %v891_v19, %v890_v18  ;;  %v1013_v25 = vmul.f32 %v2827_v22, %v3312_v1 }
 0x4cc   : > { %2597 = vmatmul.mubr.msk.bf16.vlgmr.msra.gmra.mrb[8].mxu0 %vm869_vm5, %v892_v20 }
 0x4cd   : > { %v2829_v12 = vpop.eup %2828  ;;  %2607 = vmatpush3.bf16.msra.mxu0 %v3328_v10  ;;  %2608 = vmatprep.mubr.msk.bf16.mxu0 %vm2937_vm2, %v2936_v2  ;;  %v1271_v10 = vpop.xlane.xlu0 %1270 }
 0x4ce   : > { %v1014_v23 = vmul.f32 %v2829_v12, %v3316_v4  ;;  %2618 = vmatprep.subr.bf16.mxu0 %v2936_v2 }
 0x4d0   : > { %v1015_v26 = vpack.c.bf16 %v1014_v23, %v1013_v25 }
 0x4d1   : > { %v2831_v29 = vpop.eup %2830  ;;  %v1413_v38 = vpop.permute.xlu0 %1412 }
 0x4d2   : > { %v1145_v30 = vmul.f32 %v2831_v29, %v3320_v63 }
 0x4d4   : > { %2609 = vmatmul.mubr.msk.bf16.vlgmr.msra.gmra.mrb[12].mxu0 %vm869_vm5, %v1015_v26 }
 0x4d5   : > { %2619 = vmatpush3.bf16.msra.mxu0 %v1149_v3  ;;  %2620 = vmatprep.mubr.msk.bf16.mxu0 %vm2937_vm2, %v2936_v2 }
 0x4d6   : > { %2630 = vmatprep.subr.bf16.mxu0 %v2936_v2 }
 0x4f1   : > { %v1142_v0 = vpop.xlane.xlu1 %1141 }
 0x4f2   : > { %2832 = vrcp.f32 %v1142_v0 }
 0x4f5   : > { %v1274_v27 = vpop.xlane.xlu1 %1273 }
 0x4f6   : > { %2834 = vrcp.f32 %v1274_v27 }
 0x4f7   : > { %2836 = vrcp.f32 %v1271_v10 }
 0x4f9   : > { %v1403_v4 = vpop.xlane.xlu1 %1402 }
 0x4fc   : > { %v2833_v1 = vpop.eup %2832 }
 0x4fd   : > { %v1146_v32 = vmul.f32 %v2833_v1, %v3339_v41  ;;  %v1406_v33 = vpop.xlane.xlu1 %1405  ;;  %v2770_v1 = vld [vmem:[%s3607_s13] sm:$0xff]  }
 0x4fe   : > { %2838 = vrcp.f32 %v1406_v33  ;;  %2684 = vmatprep.subr.bf16.mxu1 %v2770_v1 }
 0x4ff   : > { %v1147_v34 = vpack.c.bf16 %v1146_v32, %v1145_v30  ;;  %2840 = vrcp.f32 %v1403_v4  ;;  %v1526_v41 = vpop.xlane.xlu0 %1525  ;;  %v2771_v30 = vld [vmem:[%s3607_s13 + $0x8] sm:$0xff]   ;;  %2685 = vmatpush3.bf16.msra.mxu1 %v2770_v1 }
 0x500   : > { %v2835_v36 = vpop.eup %2834  ;;  %2686 = vmatprep.subr.bf16.mxu1 %v2771_v30 }
 0x501   : > { %v1529_v6 = vpop.xlane.xlu1 %1528  ;;  %2621 = vmatmul.mubr.msk.bf16.vlgmr.msra.gmra.mrb[16].mxu0 %vm869_vm5, %v1147_v34  ;;  %v2837_v40 = vpop.eup %2836  ;;  %v1278_v35 = vmul.f32 %v2835_v36, %v3344_v44 }
 0x502   : > { %2631 = vmatpush3.bf16.msra.mxu0 %v1281_v58  ;;  %2632 = vmatprep.mubr.msk.bf16.mxu0 %vm2937_vm2, %v2936_v2  ;;  %v1277_v63 = vmul.f32 %v2837_v40, %v3324_v8  ;;  %2842 = vrcp.f32 %v1529_v6 }
 0x503   : > { %2642 = vmatprep.subr.bf16.mxu0 %v2936_v2  ;;  %2844 = vrcp.f32 %v1526_v41  ;;  %2687 = vmatpush3.bf16.msra.mxu1 %v2771_v30 }
 0x504   : > { %v1279_v43 = vpack.c.bf16 %v1278_v35, %v1277_v63 }
 0x505   : > { %v1657_v39 = vpop.xlane.xlu1 %1656 }
 0x508   : > { %v2839_v14 = vpop.eup %2838 }
 0x509   : > { %v1660_v37 = vpop.xlane.xlu1 %1659  ;;  %2633 = vmatmul.mubr.msk.bf16.vlgmr.msra.gmra.mrb[20].mxu0 %vm869_vm5, %v1279_v43  ;;  %v2841_v45 = vpop.eup %2840  ;;  %v1410_v44 = vmul.f32 %v2839_v14, %v3354_v52 }
 0x50a   : > { %2643 = vmatpush3.bf16.msra.mxu0 %v1413_v38  ;;  %2644 = vmatprep.mubr.msk.bf16.mxu0 %vm2937_vm2, %v2936_v2  ;;  %v1409_v8 = vmul.f32 %v2841_v45, %v3349_v21  ;;  %2846 = vrcp.f32 %v1660_v37  ;;  %v1788_v52 = vpop.xlane.xlu0 %1787 }
 0x50b   : > { %2654 = vmatprep.subr.bf16.mxu0 %v2936_v2  ;;  %2848 = vrcp.f32 %v1657_v39 }
 0x50c   : > { %v1411_v17 = vpack.c.bf16 %v1410_v44, %v1409_v8  ;;  %v2843_v46 = vpop.eup %2842 }
 0x50d   : > { %v1791_v28 = vpop.xlane.xlu1 %1790  ;;  %v2845_v50 = vpop.eup %2844  ;;  %v1533_v51 = vmul.f32 %v2843_v46, %v3360_v56 }
 0x50e   : > { %v1532_v21 = vmul.f32 %v2845_v50, %v3356_v54  ;;  %2850 = vrcp.f32 %v1791_v28  ;;  %v1667_v57 = vpop.permute.xlu0 %1666 }
 0x50f   : > { %2852 = vrcp.f32 %v1788_v52 }
 0x510   : > { %v1534_v24 = vpack.c.bf16 %v1533_v51, %v1532_v21 }
 0x511   : > { %v1536_v49 = vpop.permute.xlu1 %1535  ;;  %2645 = vmatmul.mubr.msk.bf16.vlgmr.msra.gmra.mrb[24].mxu0 %vm869_vm5, %v1411_v17 }
 0x512   : > { %2655 = vmatpush3.bf16.msra.mxu0 %v1536_v49  ;;  %2656 = vmatprep.mubr.msk.bf16.mxu0 %vm2937_vm2, %v2936_v2  ;;  %v1798_v62 = vpop.permute.xlu0 %1797 }
 0x513   : > { %2666 = vmatprep.subr.bf16.mxu0 %v2936_v2 }
 0x514   : > { %v2847_v55 = vpop.eup %2846 }
 0x515   : > { %v2849_v59 = vpop.eup %2848  ;;  %v1664_v42 = vmul.f32 %v2847_v55, %v3374_v48  ;;  %v2492_v55 = vld [vmem:[%s3608_s19] ss:$0 sm:$0xff] }
 0x516   : > { %v1663_v56 = vmul.f32 %v2849_v59, %v3368_v13 }
 0x518   : > { %v1665_v61 = vpack.c.bf16 %v1664_v42, %v1663_v56  ;;  %v2851_v54 = vpop.eup %2850 }
 0x519   : > { %2657 = vmatmul.mubr.msk.bf16.vlgmr.msra.gmra.mrb[28].mxu0 %vm869_vm5, %v1534_v24  ;;  %v2853_v53 = vpop.eup %2852  ;;  %v1795_v3 = vmul.f32 %v2851_v54, %v3378_v47 }
 0x51a   : > { %2667 = vmatpush3.bf16.msra.mxu0 %v1667_v57  ;;  %2668 = vmatprep.mubr.msk.bf16.mxu0 %vm2937_vm2, %v2936_v2  ;;  %v1794_v58 = vmul.f32 %v2853_v53, %v3364_v31 }
 0x51b   : > { %2678 = vmatprep.subr.bf16.mxu0 %v2936_v2 }
 0x51c   : > { %v1796_v5 = vpack.c.bf16 %v1795_v3, %v1794_v58  ;;  %v2879_v58 = vld [vmem:[#allocation2 + $0x10] sm:$0xff] }
 0x521   : > { %2669 = vmatmul.mubr.msk.bf16.vlgmr.msra.gmra.mrb[32].mxu0 %vm869_vm5, %v1665_v61 }
 0x522   : > { %2679 = vmatpush3.bf16.msra.mxu0 %v1798_v62  ;;  %2680 = vmatprep.mubr.msk.bf16.mxu0 %vm2937_vm2, %v2936_v2  ;;  %v2878_v62 = vld [vmem:[#allocation2] sm:$0xff] }
 0x529   : > { %2681 = vmatmul.mubr.msk.bf16.vlgmr.msra.gmra.mrb[36].mxu0 %vm869_vm5, %v1796_v5 }
 0x59f   : > { %v933_v48 = vpop.f32.mrb[8].mxu0 }
 0x5a0   : > { %940 = vst.msk [vmem:[#allocation3] sm:$0xff] %vm821_vm3, %v933_v48  ;;  %v2598_v13 = vpop.f32.mrb[9].mxu0 }
 0x5a1   : > { %v936_v7 = vpop.f32.mrb[10].mxu0  ;;  %v2880_v13 = vld [vmem:[#allocation2 + $0x8] sm:$0xff] }
 0x5a2   : > { %941 = vst.msk [vmem:[#allocation3 + $0x8] sm:$0xff] %vm821_vm3, %v936_v7  ;;  %v2599_v9 = vpop.f32.mrb[11].mxu0 }
 0x5a7   : > { %v1056_v11 = vpop.f32.mrb[12].mxu0 }
 0x5a8   : > { %1065 = vrot.lane.b32.xlu0 %v1056_v11, %s2949_s28  ;;  %v2610_v2 = vpop.f32.mrb[13].mxu0 }
 0x5a9   : > { %v1059_v15 = vpop.f32.mrb[14].mxu0  ;;  %v2881_v2 = vld [vmem:[#allocation2 + $0x18] sm:$0xff] }
 0x5aa   : > { %1067 = vrot.lane.b32.xlu1 %v1059_v15, %s2949_s28  ;;  %v2611_v31 = vpop.f32.mrb[15].mxu0 }
 0x5d4   : > { %v1188_v47 = vpop.f32.mrb[16].mxu0 }
 0x5d5   : > { %1197 = vrot.lane.b32.xlu0 %v1188_v47, %s2950_s29  ;;  %v2622_v16 = vpop.f32.mrb[17].mxu0 }
 0x5d6   : > { %v1191_v18 = vpop.f32.mrb[18].mxu0 }
 0x5d7   : > { %1199 = vrot.lane.b32.xlu1 %v1191_v18, %s2950_s29  ;;  %v2623_v19 = vpop.f32.mrb[19].mxu0 }
 0x5dc   : > { %v1320_v20 = vpop.f32.mrb[20].mxu0 }
 0x5dd   : > { %1329 = vrot.lane.b32.xlu0 %v1320_v20, %s2951_s26  ;;  %v2634_v22 = vpop.f32.mrb[21].mxu0 }
 0x5de   : > { %v1323_v12 = vpop.f32.mrb[22].mxu0 }
 0x5df   : > { %1331 = vrot.lane.b32.xlu1 %v1323_v12, %s2951_s26  ;;  %v2635_v23 = vpop.f32.mrb[23].mxu0 }
 0x5e4   : > { %v1452_v25 = vpop.f32.mrb[24].mxu0 }
 0x5e5   : > { %1459 = vst.msk [vmem:[#allocation3 + $0x10] sm:$0xff] %vm821_vm3, %v1452_v25  ;;  %v2646_v26 = vpop.f32.mrb[25].mxu0 }
 0x5e6   : > { %v1455_v60 = vpop.f32.mrb[26].mxu0 }
 0x5e7   : > { %1460 = vst.msk [vmem:[#allocation3 + $0x18] sm:$0xff] %vm821_vm3, %v1455_v60  ;;  %v2647_v0 = vpop.f32.mrb[27].mxu0 }
 0x5ec   : > { %v1575_v10 = vpop.f32.mrb[28].mxu0 }
 0x5ed   : > { %1584 = vrot.lane.b32.xlu0 %v1575_v10, %s2949_s28  ;;  %v2658_v27 = vpop.f32.mrb[29].mxu0 }
 0x5ee   : > { %v1578_v4 = vpop.f32.mrb[30].mxu0 }
 0x5ef   : > { %1586 = vrot.lane.b32.xlu1 %v1578_v4, %s2949_s28  ;;  %v2659_v29 = vpop.f32.mrb[31].mxu0 }
 0x5f4   : > { %v1706_v32 = vpop.f32.mrb[32].mxu0 }
 0x5f5   : > { %1715 = vrot.lane.b32.xlu0 %v1706_v32, %s2950_s29  ;;  %v2670_v33 = vpop.f32.mrb[33].mxu0 }
 0x5f6   : > { %v1709_v34 = vpop.f32.mrb[34].mxu0 }
 0x5f7   : > { %1717 = vrot.lane.b32.xlu1 %v1709_v34, %s2950_s29  ;;  %v2671_v36 = vpop.f32.mrb[35].mxu0 }
 0x5f8   : > { %v2772_v36 = vld [vmem:[%s3087_s3] sm:$0xff]  }
 0x5f9   : > { %2692 = vmatprep.subr.bf16.mxu0 %v2772_v36 }
 0x5fa   : > { %2693 = vmatpush3.bf16.msra.mxu0 %v2772_v36 }
 0x5fc   : > { %v1837_v38 = vpop.f32.mrb[36].mxu0 }
 0x5fd   : > { %1846 = vrot.lane.b32.xlu0 %v1837_v38, %s2951_s26  ;;  %v2682_v6 = vpop.f32.mrb[37].mxu0  ;;  %v2773_v38 = vld [vmem:[%s3087_s3 + $0x8] sm:$0xff]  }
 0x5fe   : > { %v1840_v40 = vpop.f32.mrb[38].mxu0  ;;  %2694 = vmatprep.subr.bf16.mxu0 %v2773_v38 }
 0x5ff   : > { %1848 = vrot.lane.b32.xlu1 %v1840_v40, %s2951_s26  ;;  %v2683_v35 = vpop.f32.mrb[39].mxu0  ;;  %2695 = vmatpush3.bf16.msra.mxu0 %v2773_v38 }
 0x61a   : > { %v1066_v63 = vpop.permute.xlu0 %1065 }
 0x61b   : > { %1072 = vst.msk [vmem:[#allocation3] sm:$0xff] %vm1071_vm6, %v1066_v63 }
 0x61c   : > { %v1068_v41 = vpop.permute.xlu1 %1067 }
 0x61d   : > { %1073 = vst.msk [vmem:[#allocation3 + $0x8] sm:$0xff] %vm1071_vm6, %v1068_v41 }
 0x647   : > { %v1198_v39 = vpop.permute.xlu0 %1197 }
 0x648   : > { %1204 = vst.msk [vmem:[#allocation3] sm:$0xff] %vm1203_vm7, %v1198_v39 }
 0x649   : > { %v1200_v43 = vpop.permute.xlu1 %1199 }
 0x64a   : > { %1205 = vst.msk [vmem:[#allocation3 + $0x8] sm:$0xff] %vm1203_vm7, %v1200_v43 }
 0x64f   : > { %v1330_v14 = vpop.permute.xlu0 %1329 }
 0x650   : > { %1336 = vst.msk [vmem:[#allocation3] sm:$0xff] %vm1335_vm8, %v1330_v14 }
 0x651   : > { %v1332_v37 = vpop.permute.xlu1 %1331 }
 0x652   : > { %1337 = vst.msk [vmem:[#allocation3 + $0x8] sm:$0xff] %vm1335_vm8, %v1332_v37 }
 0x657   : > { %v1854_v45 = vld [vmem:[#allocation3] sm:$0xff] }
 0x659   : > { %v1855_v44 = vld [vmem:[#allocation3 + $0x8] sm:$0xff] }
 0x65a   : > { %v1858_v8 = vpack.c.bf16 %v1855_v44, %v1854_v45 }
 0x65c   : > { %2688 = vmatprep.mubr.msk.bf16.mxu1 %vm659_vm1, %v1858_v8 }
 0x65f   : > { %v1585_v28 = vpop.permute.xlu0 %1584 }
 0x660   : > { %1590 = vst.msk [vmem:[#allocation3 + $0x10] sm:$0xff] %vm1071_vm6, %v1585_v28 }
 0x661   : > { %v1587_v17 = vpop.permute.xlu1 %1586 }
 0x662   : > { %1591 = vst.msk [vmem:[#allocation3 + $0x18] sm:$0xff] %vm1071_vm6, %v1587_v17  ;;  %v2497_v17 = vld [vmem:[%s618_s27] ss:$0 sm:$0xff] }
 0x667   : > { %v1716_v46 = vpop.permute.xlu0 %1715 }
 0x668   : > { %1721 = vst.msk [vmem:[#allocation3 + $0x10] sm:$0xff] %vm1203_vm7, %v1716_v46 }
 0x669   : > { %v1718_v49 = vpop.permute.xlu1 %1717 }
 0x66a   : > { %1722 = vst.msk [vmem:[#allocation3 + $0x18] sm:$0xff] %vm1203_vm7, %v1718_v49 }
 0x66f   : > { %v1847_v50 = vpop.permute.xlu0 %1846 }
 0x670   : > { %1852 = vst.msk [vmem:[#allocation3 + $0x10] sm:$0xff] %vm1335_vm8, %v1847_v50 }
 0x671   : > { %v1849_v51 = vpop.permute.xlu1 %1848 }
 0x672   : > { %1853 = vst.msk [vmem:[#allocation3 + $0x18] sm:$0xff] %vm1335_vm8, %v1849_v51 }
 0x677   : > { %v1856_v52 = vld [vmem:[#allocation3 + $0x10] sm:$0xff] }
 0x679   : > { %v1857_v21 = vld [vmem:[#allocation3 + $0x18] sm:$0xff] }
 0x67a   : > { %v1859_v24 = vpack.c.bf16 %v1857_v21, %v1856_v52  ;;  %v2498_v21 = vld [vmem:[%s621_s23] ss:$0 sm:$0xff] }
 0x67c   : > { %2689 = vmatmul.mubr.msk.bf16.vlgmr.msra.gmra.mrb[28].mxu1 %vm659_vm1, %v1859_v24 }
 0x74f   : > { %v2690_v57 = vpop.f32.mrb[28].mxu1 }
 0x750   : > { %v1923_v59 = vpop.f32.mrb[29].mxu1  ;;  %v1932_v42 = vadd.f32 %v2690_v57, %v2492_v55 }
 0x751   : > { %v1924_v56 = vadd.f32 %v2492_v55, %v1923_v59  ;;  %v2691_v61 = vpop.f32.mrb[30].mxu1 }
 0x752   : > { %v1926_v54 = vpop.f32.mrb[31].mxu1  ;;  %v3472_v5 = vadd.f32 %v2879_v58, %v1932_v42  ;;  %v1935_v48 = vadd.f32 %v2691_v61, %v2492_v55 }
 0x753   : > { %v3470_v53 = vadd.f32 %v2878_v62, %v1924_v56  ;;  %v1927_v3 = vadd.f32 %v2492_v55, %v1926_v54 }
 0x754   : > { %v3480_v15 = vadd.f32 %v2881_v2, %v1935_v48  ;;  %v1950_v31 = vsel %vm659_vm1, %v3472_v5, 0.0  ;;  %v2777_v2 = vld [vmem:[%s3097_s17 + $0x18] sm:$0xff]  }
 0x755   : > { %v3474_v7 = vadd.f32 %v2880_v13, %v1927_v3  ;;  %v1944_v9 = vsel %vm659_vm1, %v3470_v53, 0.0  ;;  %v2774_v13 = vld [vmem:[%s3097_s17] sm:$0xff]  }
 0x756   : > { %1945 = vadd.xlane.f32.xlu0 %v1944_v9  ;;  %v1953_v47 = vsel %vm659_vm1, %v3480_v15, 0.0  ;;  %2700 = vmatprep.subr.bf16.mxu1 %v2774_v13  ;;  %v2775_v9 = vld [vmem:[%s3097_s17 + $0x8] sm:$0xff]  }
 0x757   : > { %v1947_v11 = vsel %vm659_vm1, %v3474_v7, 0.0  ;;  %2701 = vmatpush3.bf16.msra.mxu1 %v2774_v13 }
 0x758   : > { %1948 = vadd.xlane.f32.xlu1 %v1947_v11  ;;  %2702 = vmatprep.subr.bf16.mxu1 %v2775_v9  ;;  %v2776_v11 = vld [vmem:[%s3097_s17 + $0x10] sm:$0xff]  }
 0x75a   : > { %1951 = vadd.xlane.f32.xlu0 %v1950_v31  ;;  %v2778_v31 = vld [vmem:[%s3097_s17 + $0x20] sm:$0xff]  }
 0x75b   : > { %2703 = vmatpush3.bf16.msra.mxu1 %v2775_v9 }
 0x75c   : > { %2704 = vmatprep.subr.bf16.mxu1 %v2776_v11 }
 0x75e   : > { %1954 = vadd.xlane.f32.xlu0 %v1953_v47  ;;  %v2779_v47 = vld [vmem:[%s3097_s17 + $0x28] sm:$0xff]  }
 0x75f   : > { %2705 = vmatpush3.bf16.msra.mxu1 %v2776_v11 }
 0x760   : > { %2706 = vmatprep.subr.bf16.mxu1 %v2777_v2 }
 0x763   : > { %2707 = vmatpush3.bf16.msra.mxu1 %v2777_v2 }
 0x764   : > { %2708 = vmatprep.subr.bf16.mxu1 %v2778_v31 }
 0x767   : > { %2709 = vmatpush3.bf16.msra.mxu1 %v2778_v31 }
 0x768   : > { %2710 = vmatprep.subr.bf16.mxu1 %v2779_v47 }
 0x76b   : > { %2711 = vmatpush3.bf16.msra.mxu1 %v2779_v47 }
 0x7e3   : > { %v1946_v16 = vpop.xlane.xlu0 %1945 }
 0x7e4   : > { %v1956_v18 = vmul.f32 0.03125, %v1946_v16  ;;  %v2780_v16 = vld [vmem:[%s3097_s17 + $0x30] sm:$0xff]  }
 0x7e5   : > { %v1949_v19 = vpop.xlane.xlu1 %1948  ;;  %2712 = vmatprep.subr.bf16.mxu1 %v2780_v16 }
 0x7e6   : > { %v1960_v20 = vsub.f32 %v3470_v53, %v1956_v18  ;;  %v1957_v22 = vmul.f32 0.03125, %v1949_v19  ;;  %2713 = vmatpush3.bf16.msra.mxu1 %v2780_v16  ;;  %v2781_v18 = vld [vmem:[%s3097_s17 + $0x38] sm:$0xff]   ;;  %v2499_v19 = vld [vmem:[%s629_s5] ss:$0 sm:$0xff] }
 0x7e7   : > { %v1952_v12 = vpop.xlane.xlu0 %1951  ;;  %2714 = vmatprep.subr.bf16.mxu1 %v2781_v18 }
 0x7e8   : > { %v1961_v23 = vsub.f32 %v3474_v7, %v1957_v22  ;;  %v1958_v25 = vmul.f32 0.03125, %v1952_v12  ;;  %v1964_v26 = vmul.f32 %v1960_v20, %v1960_v20 }
 0x7ea   : > { %v1962_v60 = vsub.f32 %v3472_v5, %v1958_v25  ;;  %v1968_v0 = vsel %vm659_vm1, %v1964_v26, 0.0  ;;  %v1965_v10 = vmul.f32 %v1961_v23, %v1961_v23  ;;  %2715 = vmatpush3.bf16.msra.mxu1 %v2781_v18 }
 0x7eb   : > { %1969 = vadd.xlane.f32.xlu0 %v1968_v0  ;;  %v1955_v27 = vpop.xlane.xlu0 %1954 }
 0x7ec   : > { %v1959_v4 = vmul.f32 0.03125, %v1955_v27  ;;  %v1971_v29 = vsel %vm659_vm1, %v1965_v10, 0.0  ;;  %v1966_v1 = vmul.f32 %v1962_v60, %v1962_v60 }
 0x7ed   : > { %1972 = vadd.xlane.f32.xlu1 %v1971_v29 }
 0x7ee   : > { %v1963_v30 = vsub.f32 %v3480_v15, %v1959_v4  ;;  %v1974_v32 = vsel %vm659_vm1, %v1966_v1, 0.0 }
 0x7ef   : > { %1975 = vadd.xlane.f32.xlu0 %v1974_v32 }
 0x7f0   : > { %v1967_v33 = vmul.f32 %v1963_v30, %v1963_v30 }
 0x7f2   : > { %v1977_v34 = vsel %vm659_vm1, %v1967_v33, 0.0 }
 0x7f3   : > { %1978 = vadd.xlane.f32.xlu1 %v1977_v34 }
 0x878   : > { %v1970_v6 = vpop.xlane.xlu0 %1969 }
 0x879   : > { %v1980_v40 = vmul.f32 0.03125, %v1970_v6 }
 0x87a   : > { %v1973_v35 = vpop.xlane.xlu1 %1972 }
 0x87b   : > { %v1984_v63 = vadd.f32 1e-05, %v1980_v40  ;;  %v1981_v41 = vmul.f32 0.03125, %v1973_v35 }
 0x87c   : > { %v1976_v39 = vpop.xlane.xlu0 %1975 }
 0x87d   : > { %2854 = vrsqrt.f32 %v1984_v63  ;;  %v1985_v43 = vadd.f32 1e-05, %v1981_v41  ;;  %v1982_v14 = vmul.f32 0.03125, %v1976_v39 }
 0x87f   : > { %2856 = vrsqrt.f32 %v1985_v43  ;;  %v1986_v37 = vadd.f32 1e-05, %v1982_v14 }
 0x880   : > { %v1979_v45 = vpop.xlane.xlu1 %1978 }
 0x881   : > { %2858 = vrsqrt.f32 %v1986_v37  ;;  %v1983_v44 = vmul.f32 0.03125, %v1979_v45 }
 0x883   : > { %v1987_v8 = vadd.f32 1e-05, %v1983_v44 }
 0x885   : > { %2860 = vrsqrt.f32 %v1987_v8 }
 0x887   : > { %v2855_v28 = vpop.eup %2854 }
 0x888   : > { %v1992_v46 = vmul.f32 %v2855_v28, %v1960_v20 }
 0x889   : > { %v2857_v49 = vpop.eup %2856 }
 0x88a   : > { %v1993_v50 = vmul.f32 %v2857_v49, %v1961_v23  ;;  %v2002_v51 = vmul.f32 %v2497_v17, %v1992_v46  ;;  %v2508_v49 = vld [vmem:[%s637_s21] ss:$0 sm:$0xff] }
 0x88b   : > { %v2859_v52 = vpop.eup %2858 }
 0x88c   : > { %v1994_v24 = vmul.f32 %v2859_v52, %v1962_v60  ;;  %v2003_v55 = vmul.f32 %v2497_v17, %v1993_v50  ;;  %v2012_v57 = vadd.f32 %v2498_v21, %v2002_v51 }
 0x88e   : > { %v2013_v59 = vadd.f32 %v2498_v21, %v2003_v55  ;;  %v2004_v56 = vmul.f32 %v2497_v17, %v1994_v24 }
 0x88f   : > { %v2861_v42 = vpop.eup %2860 }
 0x890   : > { %v1995_v61 = vmul.f32 %v2861_v42, %v1963_v30  ;;  %v2016_v54 = vpack.c.bf16 %v2013_v59, %v2012_v57  ;;  %v2014_v3 = vadd.f32 %v2498_v21, %v2004_v56 }
 0x892   : > { %v2005_v62 = vmul.f32 %v2497_v17, %v1995_v61  ;;  %2696 = vmatprep.mubr.msk.bf16.mxu0 %vm659_vm1, %v2016_v54 }
 0x894   : > { %v2015_v58 = vadd.f32 %v2498_v21, %v2005_v62 }
 0x896   : > { %v2017_v48 = vpack.c.bf16 %v2015_v58, %v2014_v3 }
 0x898   : > { %2697 = vmatmul.mubr.msk.bf16.vlgmr.msra.gmra.mrb[40].mxu0 %vm659_vm1, %v2017_v48 }
 0x96b   : > { %v2698_v20 = vpop.f32.mrb[40].mxu0 }
 0x96c   : > { %v2090_v22 = vadd.f32 %v2698_v20, %v2499_v19  ;;  %v2081_v12 = vpop.f32.mrb[41].mxu0 }
 0x96d   : > { %v2082_v23 = vadd.f32 %v2499_v19, %v2081_v12  ;;  %v2699_v25 = vpop.f32.mrb[42].mxu0 }
 0x96e   : > { %v2506_v26 = vmul.f32 -1.702, %v2090_v22  ;;  %v2093_v60 = vadd.f32 %v2699_v25, %v2499_v19  ;;  %v2084_v0 = vpop.f32.mrb[43].mxu0 }
 0x96f   : > { %v2504_v10 = vmul.f32 -1.702, %v2082_v23  ;;  %v2085_v27 = vadd.f32 %v2499_v19, %v2084_v0 }
 0x970   : > { %v2108_v4 = vmul.f32 1.442695, %v2506_v26  ;;  %v2507_v29 = vmul.f32 -1.702, %v2093_v60 }
 0x971   : > { %v2104_v1 = vmul.f32 1.442695, %v2504_v10  ;;  %v2505_v30 = vmul.f32 -1.702, %v2085_v27 }
 0x972   : > { %2862 = vpow2.f32 %v2108_v4  ;;  %v2110_v32 = vmul.f32 1.442695, %v2507_v29 }
 0x973   : > { %2864 = vpow2.f32 %v2104_v1  ;;  %v2106_v33 = vmul.f32 1.442695, %v2505_v30 }
 0x974   : > { %2866 = vpow2.f32 %v2110_v32 }
 0x975   : > { %2868 = vpow2.f32 %v2106_v33 }
 0x97c   : > { %v2863_v34 = vpop.eup %2862 }
 0x97d   : > { %v2865_v36 = vpop.eup %2864  ;;  %v2114_v38 = vadd.f32 1.0, %v2863_v34 }
 0x97e   : > { %v2867_v6 = vpop.eup %2866  ;;  %v2112_v40 = vadd.f32 1.0, %v2865_v36 }
 0x97f   : > { %v2869_v35 = vpop.eup %2868  ;;  %2870 = vrcp.f32 %v2114_v38  ;;  %v2115_v63 = vadd.f32 1.0, %v2867_v6 }
 0x980   : > { %2872 = vrcp.f32 %v2112_v40  ;;  %v2113_v41 = vadd.f32 1.0, %v2869_v35 }
 0x981   : > { %2874 = vrcp.f32 %v2115_v63 }
 0x982   : > { %2876 = vrcp.f32 %v2113_v41 }
 0x989   : > { %v2871_v39 = vpop.eup %2870 }
 0x98a   : > { %v2873_v43 = vpop.eup %2872  ;;  %v2126_v45 = vmul.f32 %v2871_v39, %v2090_v22 }
 0x98b   : > { %v2875_v14 = vpop.eup %2874  ;;  %v2124_v8 = vmul.f32 %v2873_v43, %v2082_v23 }
 0x98c   : > { %v2877_v37 = vpop.eup %2876  ;;  %v2127_v44 = vmul.f32 %v2875_v14, %v2093_v60 }
 0x98d   : > { %v2125_v28 = vmul.f32 %v2877_v37, %v2085_v27 }
 0x98e   : > { %v2129_v17 = vpack.c.bf16 %v2127_v44, %v2126_v45 }
 0x98f   : > { %v2128_v46 = vpack.c.bf16 %v2125_v28, %v2124_v8 }
 0x991   : > { %2716 = vmatprep.mubr.bf16.mxu1 %v2128_v46 }
 0x992   : > { %2717 = vmatmul.mubr.bf16.vlgmr.msra.gmra.mrb[32].mxu1 %v2129_v17 }
 0xa65   : > { %v2718_v50 = vpop.f32.mrb[32].mxu1 }
 0xa66   : > { %v2244_v51 = vadd.f32 %v2718_v50, %v2508_v49  ;;  %v2235_v52 = vpop.f32.mrb[33].mxu1 }
 0xa67   : > { %v2236_v21 = vadd.f32 %v2508_v49, %v2235_v52  ;;  %v2719_v24 = vpop.f32.mrb[34].mxu1  ;;  %2261 = sbr.rel (%p2517_p6) target bundleno = 2678 (0xa76), region = 80 }
 0xa68   : > { %v2252_v55 = vadd.f32 %v2244_v51, %v3472_v5  ;;  %v2247_v57 = vadd.f32 %v2719_v24, %v2508_v49  ;;  %v2238_v59 = vpop.f32.mrb[35].mxu1 }
 0xa69   : > { %v2250_v42 = vadd.f32 %v2236_v21, %v3470_v53  ;;  %v2239_v56 = vadd.f32 %v2508_v49, %v2238_v59 }
 0xa6a   : > { %2256 = vst.msk [vmem:[#allocation2 + $0x10] sm:$0xff] %vm659_vm1, %v2252_v55  ;;  %v2253_v61 = vadd.f32 %v2247_v57, %v3480_v15 }
 0xa6b   : > { %2254 = vst.msk [vmem:[#allocation2] sm:$0xff] %vm659_vm1, %v2250_v42  ;;  %v2251_v54 = vadd.f32 %v2239_v56, %v3474_v7 }
 0xa6c   : > { %2257 = vst.msk [vmem:[#allocation2 + $0x18] sm:$0xff] %vm659_vm1, %v2253_v61 }
 0xa6d   : > { %2255 = vst.msk [vmem:[#allocation2 + $0x8] sm:$0xff] %vm659_vm1, %v2251_v54 }
 0xa71   : > { %v2264_v3 = vld [vmem:[#allocation2 + $0x10] sm:$0xff] }
 0xa72   : > { %v2262_v5 = vld [vmem:[#allocation2] sm:$0xff]  ;;  %2268 = vst.msk [vmem:[#allocation4 + $0x10] sm:$0xff] %vm659_vm1, %v2264_v3 }
 0xa73   : > { %2266 = vst.msk [vmem:[#allocation4] sm:$0xff] %vm659_vm1, %v2262_v5  ;;  %v2265_v53 = vld [vmem:[#allocation2 + $0x18] sm:$0xff] }
 0xa74   : > { %v2263_v62 = vld [vmem:[#allocation2 + $0x8] sm:$0xff]  ;;  %2269 = vst.msk [vmem:[#allocation4 + $0x18] sm:$0xff] %vm659_vm1, %v2265_v53 }
 0xa75   : > { %2267 = vst.msk [vmem:[#allocation4 + $0x8] sm:$0xff] %vm659_vm1, %v2263_v62 }
 0xa76 PF: > { %s3609_s30 = sld [smem:[#allocation8_spill]]  ;;  %s2952_s25 = smov [#allocation4]  }
 0xa77   : > { %s2279_s14 = sshll.u32 %s2952_s25, 4  ;;  %s2280_s14 = int_to_ptr.vmem [resolvable:$true] %s2279_s14 }
 0xa78   : > { %s2882_s29 = scalar_lea.vmem %s2280_s14, 512  ;;  %p2889_p11 = scmp.lt.s32.totalorder %s2280_s14, %s2280_s14 }
 0xa79   : > { %p2883_p8 = scmp.ne.s32.totalorder %s2280_s14, %s2882_s29  ;;  %p2890_p12 = scmp.lt.s32.totalorder %s2882_s29, %s2882_s29 }
 0xa7b   : > { %p2891_p13 = por %p2890_p12, %p2889_p11 }
 0xa7c   : > { %s3610_s21 = sadd.s32 4294967295, %s3609_s30  }
 0xa7d   : > { %p3541_p7 = scmp.eq.s32.totalorder %s3610_s21, 1 }
 0xa7f   : > { %p2884_p9 = pnand %p2883_p8, %p3541_p7 }
 0xa81   : > { %p2885_p10 = pneg %p2884_p9 }
 0xa83   : > { %p2892_p0 = pnand %p2891_p13, %p2885_p10 }
 0xa85   : > { %2895 = shalt.err (!%p2892_p0)
}
 0xa86   : > { %s3612_s15 = sld [smem:[#allocation13_spill]] }
 0xa8c   : > { %s2896_s16 = scalar_lea.hbm %s3612_s15, 512 }
 0xa8d   : > { %p2897_p1 = scmp.ne.s32.totalorder %s3612_s15, %s2896_s16  ;;  %p2902_p4 = scmp.lt.u32.totalorder %s2896_s16, %s3612_s15 }
 0xa8f   : > { %p2898_p2 = pnand %p2897_p1, %p3541_p7 }
 0xa91   : > { %p2899_p3 = pneg %p2898_p2 }
 0xa93   : > { %p2904_p5 = pnand %p2902_p4, %p2899_p3 }
 0xa95   : > { %2907 = shalt.err (!%p2904_p5)
}
 0xa96   : > { %s2953_s20 = smov 128  }
 0xa97   : > { %2721 = dma.vmem_to_hbm [thread:$0]  (%p3541_p7), %s2280_s14, 512, %s3612_s15, [#allocation5], %s2953_s20, %s2953_s20, %s2949_s28  }
 0xa98   : > { %2921 = dma.done.wait (%p3541_p7), [#allocation5], 512  }
 0xa99   : > { %2923 = vsyncadd (%p3541_p7), [#allocation5], 4294966784 }
 0xa9a PF: > { %s3613_s5 = sld [smem:[#allocation8_spill]]  ;;  %s3614_s25 = sld [smem:[#allocation7_spill]] }
 0xa9b   : > { %s3615_s26 = sld [smem:[#allocation9_spill]] }
 0xaa0   : > { %s24_s27 = sadd.s32 1, %s3613_s5  }
 0xaa1   : > { %p21_p6 = scmp.ge.s32.totalorder %s24_s27, 4  }
 0xaa3   :  { %23 = sbr.rel (!%p21_p6) target bundleno = 6 (0x6), region = 144 }
 0xaaa   :  { %2295 = vsyncpa [#allocation5], 1 }
 0xaab   :  { %2297 = vsyncpa [#allocation5 + $0x1], 1 }

</bundles_post_ra>
